<compile_context>
chip_gen: v6e
topology: v6e:2x2x1
jax: 0.10.0
libtpu: 0.0.40
codegen_flags: <defaults>
</compile_context>

<pallas_src>
import math

import numpy as np

import jax
import jax.numpy as jnp
from jax.experimental import pallas as pl
from jax.experimental.pallas import tpu as pltpu

_TWO_PI = 2.0 * math.pi

# Matmul VMEM working-set budget: kept under v5e's 16 MiB default scoped VMEM
# (v6e / v7x have 32 MiB scoped) so no vmem_limit_bytes override is needed.
_VMEM_BUDGET = 14 * 1024 * 1024


def _round_up(x, m):
    return ((x + m - 1) // m) * m


# ----------------------------------------------------------------------------
# Pallas kernels
# ----------------------------------------------------------------------------
def _matmul_kernel(a_ref, b_ref, o_ref):
    # bf16 MXU inputs, f32 accumulation/output.
    o_ref[...] = jnp.dot(a_ref[...], b_ref[...], preferred_element_type=jnp.float32)


def _choose_tiles(M, K, Np, tile_m, tile_n):
    """Pick (tm, tn, resident_B) under the VMEM budget (double-buffered)."""
    b_resident_bytes = 2 * K * Np * 2  # bf16, x2 buffers
    resident = b_resident_bytes <= _VMEM_BUDGET // 2
    tn = Np if resident else min(tile_n, Np)

    # >=2 blocks along the parallel M axis so both v7x TensorCores get work.
    if M > 8:
        tm = min(tile_m, _round_up(pl.cdiv(M, 2), 8))
    else:
        tm = 8

    def fits(tm_):
        a_bytes = tm_ * K * 2          # bf16 A tile
        o_bytes = tm_ * tn * 4         # f32 out tile
        b_bytes = K * tn * 2           # bf16 B tile
        return 2 * (a_bytes + o_bytes + b_bytes) <= _VMEM_BUDGET

    while tm > 8 and not fits(tm):
        tm = max(8, _round_up(tm // 2, 8))
    return tm, tn, resident


def pallas_matmul(a, b, tile_m=512, tile_n=512):
    """[M, K] @ [K, N] -> [M, >=N] float32 (bf16 MXU inputs, f32 accumulation).

    Returns an array with up to 127 lane-padding columns; callers must only read
    the first N columns.  Ragged M tiles rely on Pallas OOB semantics: the padded
    output rows are never read downstream.
    """
    M, K = a.shape
    _, N = b.shape
    if a.dtype != jnp.bfloat16:
        a = a.astype(jnp.bfloat16)
    if b.dtype != jnp.bfloat16:
        b = b.astype(jnp.bfloat16)
    Np = _round_up(N, 128)

    # Tiny problems: pallas_call fixed cost exceeds the useful MXU work -> let XLA fuse.
    if M < 8 or M * K * Np < (1 << 18):
        return jnp.dot(a, b, preferred_element_type=jnp.float32)

    if Np != N:
        b = jnp.pad(b, ((0, 0), (0, Np - N)))

    tm, tn, resident = _choose_tiles(M, K, Np, tile_m, tile_n)
    cost = pl.CostEstimate(
        flops=2 * M * K * Np,
        transcendentals=0,
        bytes_accessed=2 * (M * K + K * Np) + 4 * M * Np,
    )

    if resident:
        # Constant index_map -> B is DMA'd exactly once and stays resident in VMEM.
        out = pl.pallas_call(
            _matmul_kernel,
            out_shape=jax.ShapeDtypeStruct((M, Np), jnp.float32),
            grid=(pl.cdiv(M, tm),),
            in_specs=[
                pl.BlockSpec((tm, K), lambda i: (i, 0)),
                pl.BlockSpec((K, Np), lambda i: (0, 0)),
            ],
            out_specs=pl.BlockSpec((tm, Np), lambda i: (i, 0)),
            compiler_params=pltpu.CompilerParams(dimension_semantics=("parallel",)),
            cost_estimate=cost,
        )(a, b)
    else:
        out = pl.pallas_call(
            _matmul_kernel,
            out_shape=jax.ShapeDtypeStruct((M, Np), jnp.float32),
            grid=(pl.cdiv(M, tm), pl.cdiv(Np, tn)),
            in_specs=[
                pl.BlockSpec((tm, K), lambda i, j: (i, 0)),
                pl.BlockSpec((K, tn), lambda i, j: (0, j)),
            ],
            out_specs=pl.BlockSpec((tm, tn), lambda i, j: (i, j)),
            compiler_params=pltpu.CompilerParams(
                dimension_semantics=("parallel", "parallel")),
            cost_estimate=cost,
        )(a, b)
    return out


def _pv_kernel(n0_ref, n1_ref, d_ref, al_ref, pa_ref, mag_ref, ph_ref):
    alphas = al_ref[...]          # (1, tc)  broadcast over rows in-kernel
    padv = pa_ref[...]            # (tr, 1)  broadcast over cols in-kernel
    ph = d_ref[...] - padv
    ph = ph - _TWO_PI * jnp.round(ph * (1.0 / _TWO_PI))
    ph = ph + padv
    mag_ref[...] = alphas * n1_ref[...] + (1.0 - alphas) * n0_ref[...]
    ph_ref[...] = ph


def pallas_phase_vocoder_core(n0, n1, delta, alphas, padv_rows,
                              tile_r=256, tile_c=512):
    """n0/n1/delta are (R=B*F, Ts) f32; alphas (1, Ts); padv_rows (R, 1)."""
    R, Ts = n0.shape
    if R > 8:
        tr = min(tile_r, _round_up(pl.cdiv(R, 2), 8))   # >=2 row blocks for v7x
    else:
        tr = 8
    tc = min(tile_c, _round_up(Ts, 128))
    grid = (pl.cdiv(R, tr), pl.cdiv(Ts, tc))
    big = pl.BlockSpec((tr, tc), lambda i, j: (i, j))
    cost = pl.CostEstimate(flops=8 * R * Ts, transcendentals=0,
                           bytes_accessed=5 * 4 * R * Ts)

    mag, ph = pl.pallas_call(
        _pv_kernel,
        out_shape=(
            jax.ShapeDtypeStruct((R, Ts), jnp.float32),
            jax.ShapeDtypeStruct((R, Ts), jnp.float32),
        ),
        grid=grid,
        in_specs=[
            big, big, big,
            pl.BlockSpec((1, tc), lambda i, j: (0, j)),
            pl.BlockSpec((tr, 1), lambda i, j: (i, 0)),
        ],
        out_specs=(big, big),
        compiler_params=pltpu.CompilerParams(
            dimension_semantics=("parallel", "parallel")),
        cost_estimate=cost,
    )(n0, n1, delta, alphas, padv_rows)
    return mag, ph


# ----------------------------------------------------------------------------
# Compile-time constants (numpy)
# ----------------------------------------------------------------------------
def _hann_np(win_length):
    n = np.arange(win_length, dtype=np.float64)
    return 0.5 - 0.5 * np.cos(2.0 * np.pi * n / win_length)


def _window_full_np(n_fft, win_length):
    w = _hann_np(win_length)
    if win_length < n_fft:
        lp = (n_fft - win_length) // 2
        w = np.pad(w, (lp, n_fft - win_length - lp))
    return w


# ----------------------------------------------------------------------------
# Plain-JAX glue reproducing torchaudio.functional.pitch_shift
# ----------------------------------------------------------------------------
def _stft(waveform, n_fft, hop, win_length):
    # torch.stft(center=True, pad_mode='reflect', onesided=True, normalized=False)
    B, T = waveform.shape
    pad = n_fft // 2
    x = jnp.pad(waveform, ((0, 0), (pad, pad)), mode="reflect")
    T_pad = T + 2 * pad
    n_frames = (T_pad - n_fft) // hop + 1

    # Framing.  When hop | n_fft this is n_fft/hop contiguous slices (no gather);
    # the bf16 cast fuses into it so the duplicated framed tensor crosses HBM at
    # half width.
    # TODO(synk): fully fusing framing into the matmul (memory_space=pl.ANY + manual
    # DMA of a contiguous slab per M-tile) would remove this HBM round trip entirely.
    if n_fft % hop == 0:
        r_fac = n_fft // hop
        parts = [
            x[:, r * hop: r * hop + n_frames * hop].reshape(B, n_frames, hop)
            for r in range(r_fac)
        ]
        frames = jnp.concatenate(parts, axis=-1).astype(jnp.bfloat16)
    else:
        idx = np.arange(n_frames)[:, None] * hop + np.arange(n_fft)[None, :]
        frames = x[:, idx].astype(jnp.bfloat16)

    F = n_fft // 2 + 1
    n = np.arange(n_fft, dtype=np.float64)[:, None]
    k = np.arange(F, dtype=np.float64)[None, :]
    ang = 2.0 * np.pi * n * k / n_fft
    window = _window_full_np(n_fft, win_length)
    # Hann window folded into the DFT matrix (compile-time constant).
    dft_w = window[:, None] * np.concatenate([np.cos(ang), -np.sin(ang)], axis=1)
    dft_w = jnp.asarray(dft_w, dtype=jnp.float32)

    out = pallas_matmul(frames.reshape(B * n_frames, n_fft), dft_w)
    out = out.reshape(B, n_frames, -1)        # padded columns never read past 2F
    re = out[..., :F].transpose(0, 2, 1)      # [B, F, n_frames]
    im = out[..., F:2 * F].transpose(0, 2, 1)
    return re, im


def _phase_vocoder(re, im, rate, phase_advance_np):
    B, F, T = re.shape
    # float64 arange matches torch.arange length semantics for float steps.
    time_steps = np.arange(0.0, float(T), rate)
    Ts = time_steps.shape[0]
    alphas = jnp.asarray((time_steps % 1.0).reshape(1, Ts), dtype=jnp.float32)

    phase_0 = jnp.arctan2(im[..., :1], re[..., :1])  # [B, F, 1]
    re_p = jnp.pad(re, ((0, 0), (0, 0), (0, 2)))
    im_p = jnp.pad(im, ((0, 0), (0, 0), (0, 2)))
    idx0 = time_steps.astype(np.int32)
    idx1 = idx0 + 1
    re0 = jnp.take(re_p, idx0, axis=-1)
    im0 = jnp.take(im_p, idx0, axis=-1)
    re1 = jnp.take(re_p, idx1, axis=-1)
    im1 = jnp.take(im_p, idx1, axis=-1)

    # Norms and the raw angle delta are computed in the same XLA fusion as the time
    # gather, so only three (B*F, Ts) arrays hit HBM before the PV kernel.
    # TODO(synk): arctan2 deliberately kept out of the Pallas kernel (Mosaic atan2
    # lowering not relied upon).
    n0 = jnp.sqrt(re0 * re0 + im0 * im0).reshape(B * F, Ts)
    n1 = jnp.sqrt(re1 * re1 + im1 * im1).reshape(B * F, Ts)
    delta = (jnp.arctan2(im1, re1) - jnp.arctan2(im0, re0)).reshape(B * F, Ts)

    padv_rows = jnp.asarray(
        np.tile(phase_advance_np.reshape(F), (B,)).reshape(B * F, 1),
        dtype=jnp.float32)

    mag, phase = pallas_phase_vocoder_core(n0, n1, delta, alphas, padv_rows)
    mag = mag.reshape(B, F, Ts)
    phase = phase.reshape(B, F, Ts)

    # TODO(synk): sequential phase accumulation (cumsum) stays in XLA glue.
    phase = jnp.concatenate([phase_0, phase[..., :-1]], axis=-1)
    phase_acc = jnp.cumsum(phase, axis=-1)
    out_re = mag * jnp.cos(phase_acc)
    out_im = mag * jnp.sin(phase_acc)
    return out_re, out_im


def _istft(re, im, n_fft, hop, win_length, length):
    B, F, Ts = re.shape
    k = np.arange(F, dtype=np.float64)[:, None]
    n = np.arange(n_fft, dtype=np.float64)[None, :]
    ang = 2.0 * np.pi * k * n / n_fft
    coeff = np.where(
        (np.arange(F) == 0) | (np.arange(F) == n_fft // 2), 1.0, 2.0)[:, None]
    window = _window_full_np(n_fft, win_length)
    # Synthesis window folded into the IDFT matrix (compile-time constant).
    idft_w = np.concatenate(
        [coeff * np.cos(ang) / n_fft, -coeff * np.sin(ang) / n_fft], axis=0
    ) * window[None, :]  # [2F, n_fft]
    idft_w = jnp.asarray(idft_w, dtype=jnp.float32)

    spec_ri = jnp.concatenate(
        [re.transpose(0, 2, 1), im.transpose(0, 2, 1)], axis=-1
    ).astype(jnp.bfloat16)  # pre-cast streaming operand, fuses with the transpose

    out = pallas_matmul(spec_ri.reshape(B * Ts, 2 * F), idft_w)
    ytmp = out[:, :n_fft].reshape(B, Ts, n_fft)

    L_full = n_fft + hop * (Ts - 1)
    if n_fft % hop == 0:
        # Overlap-add as n_fft/hop dense shifted adds (no duplicate-index scatter).
        r_fac = n_fft // hop
        y = jnp.zeros((B, L_full), jnp.float32)
        for r in range(r_fac):
            seg = ytmp[:, :, r * hop:(r + 1) * hop].reshape(B, Ts * hop)
            y = y.at[:, r * hop: r * hop + Ts * hop].add(seg)
    else:
        # TODO(synk): fallback duplicated-index scatter for hop not dividing n_fft.
        idx = (np.arange(Ts)[:, None] * hop + np.arange(n_fft)[None, :]).reshape(-1)
        y = jnp.zeros((B, L_full), jnp.float32).at[:, idx].add(ytmp.reshape(B, -1))

    # Window-square envelope is a compile-time numpy constant (zero runtime cost).
    env_np = np.zeros((L_full,), dtype=np.float64)
    wsq = window.astype(np.float64) ** 2
    for t in range(Ts):
        env_np[t * hop: t * hop + n_fft] += wsq
    env = jnp.asarray(env_np, dtype=np.float32)

    start = n_fft // 2
    end = min(start + length, L_full)
    y_s = y[:, start:end]
    env_s = env[start:end]
    y_s = y_s / jnp.where(env_s > 1e-11, env_s, 1.0)
    if start + length > L_full:
        y_s = jnp.pad(y_s, ((0, 0), (0, start + length - L_full)))
    return y_s


def _resample(x, orig_freq, new_freq):
    # torchaudio sinc_interp_hann resample (lowpass_filter_width=6, rolloff=0.99)
    B, L = x.shape
    g = math.gcd(int(orig_freq), int(new_freq))
    orig = int(orig_freq) // g
    new = int(new_freq) // g
    if orig == new:
        return x
    lowpass_filter_width = 6
    rolloff = 0.99
    base_freq = min(orig, new) * rolloff
    width = math.ceil(lowpass_filter_width * orig / base_freq)

    idx = np.arange(-width, width + orig, dtype=np.float64)[None, None] / orig
    t = np.arange(0, -new, -1, dtype=np.float64)[:, None, None] / new + idx
    t = t * base_freq
    t = np.clip(t, -lowpass_filter_width, lowpass_filter_width)
    window = np.cos(t * np.pi / lowpass_filter_width / 2.0) ** 2
    t = t * np.pi
    scale = base_freq / orig
    kern = np.where(t == 0, 1.0, np.sin(t) / np.where(t == 0, 1.0, t))
    kern = kern * window * scale  # [new, 1, K]
    K = 2 * width + orig
    kmat = jnp.asarray(kern[:, 0, :].T, dtype=jnp.float32)  # [K, new]

    xp = jnp.pad(x, ((0, 0), (width, width + orig)))
    n_out = (xp.shape[-1] - K) // orig + 1
    # TODO(synk): strided frame gather materialized in XLA (bf16); fusing it into the
    # matmul via manual DMA would remove the remaining duplicated-frame HBM traffic.
    fidx = np.arange(n_out)[:, None] * orig + np.arange(K)[None, :]
    frames = xp[:, fidx].astype(jnp.bfloat16)  # [B, n_out, K]
    out = pallas_matmul(frames.reshape(B * n_out, K), kmat)
    out = out[:, :new].reshape(B, n_out * new)

    target_length = math.ceil(new * L / orig)
    return out[:, :target_length]


def pitch_shift_pallas(
    waveform, sample_rate, n_steps, n_fft=16, hop_length=4, win_length=16,
    bins_per_octave=12,
):
    """Equivalent of PitchShift(sample_rate, n_fft, hop_length, win_length)(waveform, n_steps)."""
    waveform = waveform.astype(jnp.float32)
    ori_len = waveform.shape[-1]
    rate = 2.0 ** (-float(n_steps) / bins_per_octave)

    re, im = _stft(waveform, n_fft, hop_length, win_length)
    F = n_fft // 2 + 1
    phase_advance = np.linspace(0.0, np.pi * hop_length, F)
    if rate != 1.0:
        re, im = _phase_vocoder(re, im, rate, phase_advance)

    len_stretch = int(round(ori_len / rate))
    wav_stretch = _istft(re, im, n_fft, hop_length, win_length, len_stretch)
    wav_shift = _resample(wav_stretch, int(sample_rate / rate), sample_rate)

    shift_len = wav_shift.shape[-1]
    if shift_len > ori_len:
        wav_shift = wav_shift[..., :ori_len]
    else:
        wav_shift = jnp.pad(wav_shift, ((0, 0), (0, ori_len - shift_len)))
    return wav_shift


if __name__ == "__main__":
    key = jax.random.PRNGKey(0)
    B, T = 2, 1024
    sample_rate = 400
    n_fft, hop_length, win_length = 64, 16, 64
    n_steps = 12  # one octave up -> rate = 0.5 (exact 2:1 resample ratio)

    waveform = jax.random.normal(key, (B, T), dtype=jnp.float32)

    fn = jax.jit(lambda w: pitch_shift_pallas(
        w, sample_rate, n_steps,
        n_fft=n_fft, hop_length=hop_length, win_length=win_length))
    out = fn(waveform)
    out = jax.block_until_ready(out)
    assert out.shape == (B, T), out.shape
    assert bool(jnp.all(jnp.isfinite(out)))
    print("KERNEL_OK")
</pallas_src>

<mosaic_0001>
module attributes {stable_mosaic.version = 11 : i64} {
  func.func @_matmul_kernel(%arg0: i32, %arg1: memref<72x64xbf16, #tpu.memory_space<vmem>>, %arg2: memref<64x128xbf16, #tpu.memory_space<vmem>>, %arg3: memref<72x128xf32, #tpu.memory_space<vmem>>) attributes {dimension_semantics = [#tpu.dimension_semantics<parallel>], iteration_bounds = array<i64: 2>, scalar_prefetch = 0 : i64, scratch_operands = 0 : i64, tpu.core_type = #tpu.core_type<tc>, window_params = [{transform_indices = @transform_0, window_bounds = array<i64: 72, 64>}, {pipeline_mode = #tpu.pipeline_mode<synchronous>, transform_indices = @transform_1, window_bounds = array<i64: 64, 128>}, {transform_indices = @transform_2, window_bounds = array<i64: 72, 128>}]} {
    %c0 = arith.constant 0 : index
    %c0_0 = arith.constant 0 : index
    %0 = vector.load %arg1[%c0, %c0_0] : memref<72x64xbf16, #tpu.memory_space<vmem>>, vector<72x64xbf16>
    %c0_1 = arith.constant 0 : index
    %c0_2 = arith.constant 0 : index
    %1 = vector.load %arg2[%c0_1, %c0_2] : memref<64x128xbf16, #tpu.memory_space<vmem>>, vector<64x128xbf16>
    %cst = arith.constant dense<0.000000e+00> : vector<72x128xf32>
    %2 = tpu.matmul %0, %1, %cst {dimension_numbers = #tpu.dot_dimension_numbers<[1], [0], [0], [1], [0, 0, 1, 1], [], []>} : vector<72x64xbf16>, vector<64x128xbf16>, vector<72x128xf32> -> vector<72x128xf32>
    %c0_3 = arith.constant 0 : index
    %c0_4 = arith.constant 0 : index
    %3 = vector.load %arg3[%c0_3, %c0_4] : memref<72x128xf32, #tpu.memory_space<vmem>>, vector<72x128xf32>
    tpu.vector_store %arg3[%c0_3, %c0_4], %2 {strides = array<i32>} : memref<72x128xf32, #tpu.memory_space<vmem>>, vector<72x128xf32>,
    return
  }
  func.func @transform_0(%arg0: i32) -> (i32, i32) {
    %c0_i32 = arith.constant 0 : i32
    %c0_i32_0 = arith.constant 0 : i32
    return %arg0, %c0_i32 : i32, i32
  }
  func.func @transform_1(%arg0: i32) -> (i32, i32) {
    %c0_i32 = arith.constant 0 : i32
    %c0_i32_0 = arith.constant 0 : i32
    %c0_i32_1 = arith.constant 0 : i32
    return %c0_i32, %c0_i32_0 : i32, i32
  }
  func.func @transform_2(%arg0: i32) -> (i32, i32) {
    %c0_i32 = arith.constant 0 : i32
    %c0_i32_0 = arith.constant 0 : i32
    return %arg0, %c0_i32 : i32, i32
  }
}

module attributes {stable_mosaic.version = 11 : i64} {
  func.func @_pv_kernel(%arg0: i32, %arg1: i32, %arg2: memref<40x256xf32, #tpu.memory_space<vmem>>, %arg3: memref<40x256xf32, #tpu.memory_space<vmem>>, %arg4: memref<40x256xf32, #tpu.memory_space<vmem>>, %arg5: memref<1x256xf32, #tpu.memory_space<vmem>>, %arg6: memref<40x1xf32, #tpu.memory_space<vmem>>, %arg7: memref<40x256xf32, #tpu.memory_space<vmem>>, %arg8: memref<40x256xf32, #tpu.memory_space<vmem>>) attributes {dimension_semantics = [#tpu.dimension_semantics<parallel>, #tpu.dimension_semantics<parallel>], iteration_bounds = array<i64: 2, 1>, scalar_prefetch = 0 : i64, scratch_operands = 0 : i64, tpu.core_type = #tpu.core_type<tc>, window_params = [{transform_indices = @transform_0, window_bounds = array<i64: 40, 256>}, {transform_indices = @transform_1, window_bounds = array<i64: 40, 256>}, {transform_indices = @transform_2, window_bounds = array<i64: 40, 256>}, {transform_indices = @transform_3, window_bounds = array<i64: 1, 256>}, {transform_indices = @transform_4, window_bounds = array<i64: 40, 1>}, {transform_indices = @transform_5, window_bounds = array<i64: 40, 256>}, {transform_indices = @transform_6, window_bounds = array<i64: 40, 256>}]} {
    %c0 = arith.constant 0 : index
    %c0_0 = arith.constant 0 : index
    %0 = vector.load %arg5[%c0, %c0_0] : memref<1x256xf32, #tpu.memory_space<vmem>>, vector<1x256xf32>
    %c0_1 = arith.constant 0 : index
    %c0_2 = arith.constant 0 : index
    %1 = vector.load %arg6[%c0_1, %c0_2] : memref<40x1xf32, #tpu.memory_space<vmem>>, vector<40x1xf32>
    %c0_3 = arith.constant 0 : index
    %c0_4 = arith.constant 0 : index
    %2 = vector.load %arg4[%c0_3, %c0_4] : memref<40x256xf32, #tpu.memory_space<vmem>>, vector<40x256xf32>
    %3 = vector.broadcast %1 : vector<40x1xf32> to vector<40x256xf32>
    %4 = arith.subf %2, %3 : vector<40x256xf32>
    %cst = arith.constant 0.159154937 : f32
    %5 = vector.broadcast %cst : f32 to vector<40x256xf32>
    %6 = arith.mulf %4, %5 : vector<40x256xf32>
    %7 = math.roundeven %6 : vector<40x256xf32>
    %cst_5 = arith.constant 6.28318548 : f32
    %8 = vector.broadcast %cst_5 : f32 to vector<40x256xf32>
    %9 = arith.mulf %8, %7 : vector<40x256xf32>
    %10 = arith.subf %4, %9 : vector<40x256xf32>
    %11 = vector.broadcast %1 : vector<40x1xf32> to vector<40x256xf32>
    %12 = arith.addf %10, %11 : vector<40x256xf32>
    %c0_6 = arith.constant 0 : index
    %c0_7 = arith.constant 0 : index
    %13 = vector.load %arg3[%c0_6, %c0_7] : memref<40x256xf32, #tpu.memory_space<vmem>>, vector<40x256xf32>
    %14 = vector.broadcast %0 : vector<1x256xf32> to vector<40x256xf32>
    %15 = arith.mulf %14, %13 : vector<40x256xf32>
    %cst_8 = arith.constant 1.000000e+00 : f32
    %16 = vector.broadcast %cst_8 : f32 to vector<1x256xf32>
    %17 = arith.subf %16, %0 : vector<1x256xf32>
    %c0_9 = arith.constant 0 : index
    %c0_10 = arith.constant 0 : index
    %18 = vector.load %arg2[%c0_9, %c0_10] : memref<40x256xf32, #tpu.memory_space<vmem>>, vector<40x256xf32>
    %19 = vector.broadcast %17 : vector<1x256xf32> to vector<40x256xf32>
    %20 = arith.mulf %19, %18 : vector<40x256xf32>
    %21 = arith.addf %15, %20 : vector<40x256xf32>
    %c0_11 = arith.constant 0 : index
    %c0_12 = arith.constant 0 : index
    %22 = vector.load %arg7[%c0_11, %c0_12] : memref<40x256xf32, #tpu.memory_space<vmem>>, vector<40x256xf32>
    tpu.vector_store %arg7[%c0_11, %c0_12], %21 {strides = array<i32>} : memref<40x256xf32, #tpu.memory_space<vmem>>, vector<40x256xf32>,
    %c0_13 = arith.constant 0 : index
    %c0_14 = arith.constant 0 : index
    %23 = vector.load %arg8[%c0_13, %c0_14] : memref<40x256xf32, #tpu.memory_space<vmem>>, vector<40x256xf32>
    tpu.vector_store %arg8[%c0_13, %c0_14], %12 {strides = array<i32>} : memref<40x256xf32, #tpu.memory_space<vmem>>, vector<40x256xf32>,
    return
  }
  func.func @transform_0(%arg0: i32, %arg1: i32) -> (i32, i32) {
    %c0_i32 = arith.constant 0 : i32
    return %arg0, %arg1 : i32, i32
  }
  func.func @transform_1(%arg0: i32, %arg1: i32) -> (i32, i32) {
    %c0_i32 = arith.constant 0 : i32
    return %arg0, %arg1 : i32, i32
  }
  func.func @transform_2(%arg0: i32, %arg1: i32) -> (i32, i32) {
    %c0_i32 = arith.constant 0 : i32
    return %arg0, %arg1 : i32, i32
  }
  func.func @transform_3(%arg0: i32, %arg1: i32) -> (i32, i32) {
    %c0_i32 = arith.constant 0 : i32
    %c0_i32_0 = arith.constant 0 : i32
    return %c0_i32, %arg1 : i32, i32
  }
  func.func @transform_4(%arg0: i32, %arg1: i32) -> (i32, i32) {
    %c0_i32 = arith.constant 0 : i32
    %c0_i32_0 = arith.constant 0 : i32
    return %arg0, %c0_i32 : i32, i32
  }
  func.func @transform_5(%arg0: i32, %arg1: i32) -> (i32, i32) {
    %c0_i32 = arith.constant 0 : i32
    return %arg0, %arg1 : i32, i32
  }
  func.func @transform_6(%arg0: i32, %arg1: i32) -> (i32, i32) {
    %c0_i32 = arith.constant 0 : i32
    return %arg0, %arg1 : i32, i32
  }
}

module attributes {stable_mosaic.version = 11 : i64} {
  func.func @_matmul_kernel(%arg0: i32, %arg1: memref<136x66xbf16, #tpu.memory_space<vmem>>, %arg2: memref<66x128xbf16, #tpu.memory_space<vmem>>, %arg3: memref<136x128xf32, #tpu.memory_space<vmem>>) attributes {dimension_semantics = [#tpu.dimension_semantics<parallel>], iteration_bounds = array<i64: 2>, scalar_prefetch = 0 : i64, scratch_operands = 0 : i64, tpu.core_type = #tpu.core_type<tc>, window_params = [{transform_indices = @transform_0, window_bounds = array<i64: 136, 66>}, {pipeline_mode = #tpu.pipeline_mode<synchronous>, transform_indices = @transform_1, window_bounds = array<i64: 66, 128>}, {transform_indices = @transform_2, window_bounds = array<i64: 136, 128>}]} {
    %c0 = arith.constant 0 : index
    %c0_0 = arith.constant 0 : index
    %0 = vector.load %arg1[%c0, %c0_0] : memref<136x66xbf16, #tpu.memory_space<vmem>>, vector<136x66xbf16>
    %c0_1 = arith.constant 0 : index
    %c0_2 = arith.constant 0 : index
    %1 = vector.load %arg2[%c0_1, %c0_2] : memref<66x128xbf16, #tpu.memory_space<vmem>>, vector<66x128xbf16>
    %cst = arith.constant dense<0.000000e+00> : vector<136x128xf32>
    %2 = tpu.matmul %0, %1, %cst {dimension_numbers = #tpu.dot_dimension_numbers<[1], [0], [0], [1], [0, 0, 1, 1], [], []>} : vector<136x66xbf16>, vector<66x128xbf16>, vector<136x128xf32> -> vector<136x128xf32>
    %c0_3 = arith.constant 0 : index
    %c0_4 = arith.constant 0 : index
    %3 = vector.load %arg3[%c0_3, %c0_4] : memref<136x128xf32, #tpu.memory_space<vmem>>, vector<136x128xf32>
    tpu.vector_store %arg3[%c0_3, %c0_4], %2 {strides = array<i32>} : memref<136x128xf32, #tpu.memory_space<vmem>>, vector<136x128xf32>,
    return
  }
  func.func @transform_0(%arg0: i32) -> (i32, i32) {
    %c0_i32 = arith.constant 0 : i32
    %c0_i32_0 = arith.constant 0 : i32
    return %arg0, %c0_i32 : i32, i32
  }
  func.func @transform_1(%arg0: i32) -> (i32, i32) {
    %c0_i32 = arith.constant 0 : i32
    %c0_i32_0 = arith.constant 0 : i32
    %c0_i32_1 = arith.constant 0 : i32
    return %c0_i32, %c0_i32_0 : i32, i32
  }
  func.func @transform_2(%arg0: i32) -> (i32, i32) {
    %c0_i32 = arith.constant 0 : i32
    %c0_i32_0 = arith.constant 0 : i32
    return %arg0, %c0_i32 : i32, i32
  }
}

module attributes {stable_mosaic.version = 11 : i64} {
  func.func @_matmul_kernel(%arg0: i32, %arg1: memref<512x28xbf16, #tpu.memory_space<vmem>>, %arg2: memref<28x128xbf16, #tpu.memory_space<vmem>>, %arg3: memref<512x128xf32, #tpu.memory_space<vmem>>) attributes {dimension_semantics = [#tpu.dimension_semantics<parallel>], iteration_bounds = array<i64: 5>, scalar_prefetch = 0 : i64, scratch_operands = 0 : i64, tpu.core_type = #tpu.core_type<tc>, window_params = [{transform_indices = @transform_0, window_bounds = array<i64: 512, 28>}, {pipeline_mode = #tpu.pipeline_mode<synchronous>, transform_indices = @transform_1, window_bounds = array<i64: 28, 128>}, {transform_indices = @transform_2, window_bounds = array<i64: 512, 128>}]} {
    %c0 = arith.constant 0 : index
    %c0_0 = arith.constant 0 : index
    %0 = vector.load %arg1[%c0, %c0_0] : memref<512x28xbf16, #tpu.memory_space<vmem>>, vector<512x28xbf16>
    %c0_1 = arith.constant 0 : index
    %c0_2 = arith.constant 0 : index
    %1 = vector.load %arg2[%c0_1, %c0_2] : memref<28x128xbf16, #tpu.memory_space<vmem>>, vector<28x128xbf16>
    %cst = arith.constant dense<0.000000e+00> : vector<512x128xf32>
    %2 = tpu.matmul %0, %1, %cst {dimension_numbers = #tpu.dot_dimension_numbers<[1], [0], [0], [1], [0, 0, 1, 1], [], []>} : vector<512x28xbf16>, vector<28x128xbf16>, vector<512x128xf32> -> vector<512x128xf32>
    %c0_3 = arith.constant 0 : index
    %c0_4 = arith.constant 0 : index
    %3 = vector.load %arg3[%c0_3, %c0_4] : memref<512x128xf32, #tpu.memory_space<vmem>>, vector<512x128xf32>
    tpu.vector_store %arg3[%c0_3, %c0_4], %2 {strides = array<i32>} : memref<512x128xf32, #tpu.memory_space<vmem>>, vector<512x128xf32>,
    return
  }
  func.func @transform_0(%arg0: i32) -> (i32, i32) {
    %c0_i32 = arith.constant 0 : i32
    %c0_i32_0 = arith.constant 0 : i32
    return %arg0, %c0_i32 : i32, i32
  }
  func.func @transform_1(%arg0: i32) -> (i32, i32) {
    %c0_i32 = arith.constant 0 : i32
    %c0_i32_0 = arith.constant 0 : i32
    %c0_i32_1 = arith.constant 0 : i32
    return %c0_i32, %c0_i32_0 : i32, i32
  }
  func.func @transform_2(%arg0: i32) -> (i32, i32) {
    %c0_i32 = arith.constant 0 : i32
    %c0_i32_0 = arith.constant 0 : i32
    return %arg0, %c0_i32 : i32, i32
  }
}

</mosaic_0001>

<bundles_post_ra>
// kernel: _lambda_.4
= control target key start
LH: loop header
LB: loop body
LE: loop exit
PB: predicated region body
PF: predicated region fallthrough
CT: control target
= control target key end

     0   :  { %7 = vsyncpa [#allocation3], 0  ;;  %s939_s9 = smov 0   ;;  %s941_s10 = smov 0   ;;  %s1070_s0 = inlined_call_operand.vmem [shape: bf16[130,64], index: 0, kind: input, shape index: {}]   ;;  %s1071_s1 = inlined_call_operand.hbm [shape: bf16[64,128], index: 1, kind: input, shape index: {}]   ;;  %s1072_s2 = inlined_call_operand.vmem [shape: f32[130,128], index: 2, kind: output, shape index: {}]  }
   0x1   :  { %s943_s11 = smov 0  }
   0x2 LB: > { %s952_s12 = sadd.s32 4294967295, %s885_s11   ;;  %s954_s13 = sadd.s32 1, %s885_s11   ;;  %s885_s11 = sphi %s943_s11, %s1080_s11   ;;  %s881_s10 = sphi %s941_s10, %s1079_s10   ;;  %s877_s9 = sphi %s939_s9, %s1078_s9  }
   0x3   : > { %s64_s14 = ssub.s32 %s885_s11, %s954_s13  ;;  %s67_s15 = sadd.s32 1, %s881_s10 }
   0x4   : > { %p65_p0 = scmp.eq.s32.totalorder %s64_s14, 0  ;;  %p77_p1 = scmp.ne.s32.totalorder %s881_s10, %s877_s9 }
   0x5   : > { %p78_p2 = scmp.eq.s32.totalorder %s952_s12, 1  ;;  %p605_p3 = scmp.ge.s32.totalorder %s885_s11, 1 }
   0x6   : > { %s962_s16 = scalar_select %p65_p0, %s881_s10, %s67_s15  }
   0x7   : > { %p964_p4 = por %p78_p2, %p77_p1  ;;  %p91_p5 = scmp.lt.s32.totalorder %s885_s11, 3 }
   0x8   : > { %p692_p6 = scmp.eq.s32.totalorder %s952_s12, 0  ;;  %s919_s19 = smov [#allocation2]  }
   0x9   : > { %p969_p7 = pnand %p605_p3, %p91_p5  ;;  %s103_s20 = sshll.u32 %s919_s19, 4  ;;  %s104_s20 = int_to_ptr.vmem [resolvable:$true] %s103_s20 }
   0xa   : > { %s812_s21 = scalar_lea.vmem %s104_s20, 512  ;;  %p820_p0 = scmp.lt.s32.totalorder %s104_s20, %s104_s20 }
   0xb   : > { %p688_p8 = pneg %p969_p7  ;;  %p813_p11 = scmp.ne.s32.totalorder %s104_s20, %s812_s21 }
   0xc   : > { %p821_p1 = scmp.lt.s32.totalorder %s812_s21, %s812_s21 }
   0xd   : > { %p689_p9 = pnand %p692_p6, %p688_p8 }
   0xe   : > { %p822_p2 = por %p821_p1, %p820_p0 }
   0xf   : > { %p803_p10 = pneg %p689_p9 }
  0x11   : > { %p815_p12 = pnand %p813_p11, %p803_p10 }
  0x13   : > { %p816_p13 = pneg %p815_p12 }
  0x15   : > { %p823_p3 = pnand %p822_p2, %p816_p13 }
  0x17   : > { %826 = shalt.err (!%p823_p3)
}
  0x18   : > { %s920_s22 = smov 64   ;;  %s921_s23 = smov 4  }
  0x19   : > { %691 = dma.hbm_to_vmem [thread:$0]  (!%p689_p9), %s1071_s1, 512, %s104_s20, [#allocation3], %s920_s22, %s920_s22, %s921_s23  }
  0x1a   : > { %136 = sbr.rel (%p969_p7) target bundleno = 318 (0x13e), region = 28 }
  0x1f   : > { %872 = dma.done.wait (%p692_p6), [#allocation3], 512  }
  0x20   : > { %874 = vsyncadd (%p692_p6), [#allocation3], 4294966784  ;;  %s987_s26 = smul.u32 9, %s952_s12  ;;  %v922_v0 = vmov 0.0   ;;  %vm923_vm0 = vmmov 0   ;;  %v788_v1 = vld [vmem:[#allocation2 + $0x18] sm:$0xff]  }
  0x21   : > { %647 = vmatprep.subr.bf16.mxu0 %v922_v0  ;;  %675 = vmatprep.subr.bf16.mxu1 %v922_v0  ;;  %v789_v2 = vld [vmem:[#allocation2 + $0x10] sm:$0xff]   ;;  %v790_v3 = vld [vmem:[#allocation2 + $0x8] sm:$0xff]   ;;  %v791_v4 = vld [vmem:[#allocation2] sm:$0xff]   ;;  %vm245_vm1 = vcmask 523264   ;;  %s158_s4 = sand.u32 1, %s877_s9   ;;  %s637_s8 = smul.u32 (%p964_p4), 72, %s952_s12 }
  0x22   : > { %655 = vmatprep.mubr.msk.bf16.mxu0 %vm923_vm0, %v922_v0  ;;  %p166_p5 = scmp.lt.s32.totalorder %s987_s26, 16  ;;  %667 = vmatprep.mubr.msk.bf16.mxu1 %vm923_vm0, %v922_v0  ;;  %s683_s5 = smul.u32 72, %s158_s4 }
  0x23   : > { %648 = vmatpush3.bf16.msra.mxu0 %v788_v1  ;;  %679 = vmatpush3.bf16.msra.mxu1 %v788_v1  ;;  %s350_s7 = ssub.s32 (%p964_p4), 17, %s987_s26  ;;  %s1018_s14 = scalar_lea.vmem (%p964_p4), %s1072_s2, %s637_s8  }
  0x24   : > { %s167_s27 = scalar_select %p166_p5, %s987_s26, 16  ;;  %649 = vmatprep.subr.bf16.mxu0 %v922_v0  ;;  %676 = vmatprep.subr.bf16.mxu1 %v922_v0 }
  0x25   : > { %s1000_s6 = scalar_lea.vmem [#allocation4], %s683_s5   ;;  %p351_p6 = scmp.lt.s32.totalorder (%p964_p4), %s350_s7, 9 }
  0x26   : > { %s610_s28 = sshll.u32 %s167_s27, 2 }
  0x27   : > { %s169_s3 = scalar_lea.vmem %s1070_s0, %s610_s28  ;;  %650 = vmatpush3.bf16.msra.mxu0 %v789_v2  ;;  %680 = vmatpush3.bf16.msra.mxu1 %v789_v2 }
  0x28   : > { %651 = vmatprep.subr.bf16.mxu0 %v922_v0  ;;  %677 = vmatprep.subr.bf16.mxu1 %v922_v0  ;;  %v792_v5 = vld [vmem:[%s169_s3] sm:$0xff]   ;;  %v793_v6 = vld [vmem:[%s169_s3 + $0x18] sm:$0xff]   ;;  %v794_v7 = vld [vmem:[%s169_s3 + $0x8] sm:$0xff]  }
  0x29   : > { %v795_v8 = vld [vmem:[%s169_s3 + $0x20] ss:$0 sps:$4 sm:$0xff]   ;;  %v796_v9 = vld [vmem:[%s169_s3 + $0x10] sm:$0xff]  }
  0x2b   : > { %652 = vmatpush3.bf16.msra.mxu0 %v790_v3  ;;  %681 = vmatpush3.bf16.msra.mxu1 %v790_v3 }
  0x2c   : > { %653 = vmatprep.subr.bf16.mxu0 %v922_v0  ;;  %678 = vmatprep.subr.bf16.mxu1 %v922_v0 }
  0x2f   : > { %654 = vmatpush3.bf16.msra.mxu0 %v791_v4  ;;  %682 = vmatpush3.bf16.msra.mxu1 %v791_v4 }
  0x32   : > { %656 = vmatmul.mubr.msk.bf16.vlgmr.msra.gmra.mxu0 %vm245_vm1, %v792_v5  ;;  %668 = vmatmul.mubr.msk.bf16.vlgmr.msra.gmra.mxu1 %vm245_vm1, %v793_v6 }
  0x33   : > { %659 = vmatprep.mubr.msk.bf16.mxu0 %vm923_vm0, %v922_v0  ;;  %671 = vmatprep.mubr.msk.bf16.mxu1 %vm923_vm0, %v922_v0 }
  0x3a   : > { %660 = vmatmul.mubr.msk.bf16.gmra.mxu0 %vm245_vm1, %v794_v7  ;;  %672 = vmatmul.mubr.msk.bf16.gmra.mxu1 %vm245_vm1, %v795_v8 }
  0x3b   : > { %663 = vmatprep.mubr.msk.bf16.mxu0 %vm923_vm0, %v922_v0 }
  0x42   : > { %664 = vmatmul.mubr.msk.bf16.gmra.mxu0 %vm245_vm1, %v796_v9 }
  0xf2   : > { %v295_v10 = vpop.f32.mrf.mxu0  ;;  %v319_v11 = vpop.f32.mrf.mxu1 }
  0xf3   : > { %333 = vst [vmem:[%s1000_s6] sm:$0xff] %v295_v10  ;;  %339 = vst [vmem:[%s1000_s6 + $0x30] sm:$0xff] %v319_v11 }
  0xf4   : > { %v657_v12 = vpop.f32.mrf.mxu0  ;;  %v669_v13 = vpop.f32.mrf.mxu1 }
  0xf6   : > { %v298_v14 = vpop.f32.mrf.mxu0  ;;  %v322_v15 = vpop.f32.mrf.mxu1 }
  0xf7   : > { %334 = vst [vmem:[%s1000_s6 + $0x8] sm:$0xff] %v298_v14  ;;  %340 = vst [vmem:[%s1000_s6 + $0x38] sm:$0xff] %v322_v15 }
  0xf8   : > { %v658_v16 = vpop.f32.mrf.mxu0  ;;  %v670_v17 = vpop.f32.mrf.mxu1 }
  0xfa   : > { %v303_v18 = vpop.f32.mrf.mxu0  ;;  %v327_v19 = vpop.f32.mrf.mxu1 }
  0xfb   : > { %335 = vst [vmem:[%s1000_s6 + $0x10] sm:$0xff] %v303_v18  ;;  %341 = vst [vmem:[%s1000_s6 + $0x40] sm:$0xff] %v327_v19 }
  0xfc   : > { %v661_v20 = vpop.f32.mrf.mxu0  ;;  %v673_v21 = vpop.f32.mrf.mxu1 }
  0xfe   : > { %v306_v22 = vpop.f32.mrf.mxu0  ;;  %v330_v23 = vpop.f32.mrf.mxu1 }
  0xff   : > { %336 = vst [vmem:[%s1000_s6 + $0x18] sm:$0xff] %v306_v22 }
 0x100   : > { %v662_v24 = vpop.f32.mrf.mxu0  ;;  %v674_v25 = vpop.f32.mrf.mxu1 }
 0x102   : > { %v311_v26 = vpop.f32.mrf.mxu0 }
 0x103   : > { %337 = vst [vmem:[%s1000_s6 + $0x20] sm:$0xff] %v311_v26 }
 0x104   : > { %v665_v27 = vpop.f32.mrf.mxu0  ;;  %348 = sbr.rel (!%p964_p4) target bundleno = 318 (0x13e), region = 36 }
 0x106   : > { %v314_v28 = vpop.f32.mrf.mxu0 }
 0x107   : > { %338 = vst [vmem:[%s1000_s6 + $0x28] sm:$0xff] %v314_v28 }
 0x108   : > { %v666_v29 = vpop.f32.mrf.mxu0 }
 0x109   : > { %s1082_s7 = smov (!%p351_p6, %s350_s7), 9 }
 0x10a   : > { %s625_s15 = sshll.u32 %s1082_s7, 7 }
 0x10b   : > { %p628_p7 = scmp.eq.s32.totalorder %s625_s15, 0 }
 0x10c   : > { %797 = sdivrem.u32 (!%p628_p7), %s1082_s7, 9 }
 0x10d   : > { %359 = sbr.rel (%p628_p7) target bundleno = 318 (0x13e), region = 40 }
 0x115   : > { %s1024_s17 = spop.drf %797 }
 0x116   : > { %p629_p4 = scmp.le.s32.totalorder %s1024_s17, 0 }
 0x117   : > { %s1075_s12 = smov (!%p629_p4), %s1018_s14  ;;  %s1076_s18 = smov (!%p629_p4), %s1000_s6 }
 0x118   : > { %551 = sbr.rel (%p629_p4) target bundleno = 293 (0x125), region = 117  ;;  %s1033_s19 = smov (!%p629_p4), 0  }
 0x119   : > { %s1035_s20 = smov (!%p629_p4), 0  }
 0x11d LB: >> { %v440_v30 = vld [vmem:[%s893_s18] sm:$0xff]  ;;  %v442_v31 = vld [vmem:[%s893_s18 + $0x8] sm:$0xff]  ;;  %v444_v32 = vld [vmem:[%s893_s18 + $0x10] sm:$0xff]  ;;  %s458_s21 = sadd.s32 1, %s897_s19  ;;  %s434_s20 = sadd.s32 1, %s901_s20   ;;  %s901_s20 = sphi %s1035_s20, %s434_s20   ;;  %s897_s19 = sphi %s1033_s19, %s1077_s19   ;;  %s893_s18 = sphi %s1076_s18, %s463_s18   ;;  %s889_s12 = sphi %s1075_s12, %s464_s12  }
 0x11e   : >> { %441 = vst [vmem:[%s889_s12] sm:$0xff] %v440_v30  ;;  %443 = vst [vmem:[%s889_s12 + $0x8] sm:$0xff] %v442_v31  ;;  %v446_v33 = vld [vmem:[%s893_s18 + $0x18] sm:$0xff]  ;;  %v448_v34 = vld [vmem:[%s893_s18 + $0x20] sm:$0xff]  ;;  %p459_p8 = scmp.ge.s32.totalorder %s458_s21, %s1024_s17  ;;  %p433_p9 = scmp.ge.s32.totalorder %s434_s20, %s1024_s17 }
 0x11f   : >> { %445 = vst [vmem:[%s889_s12 + $0x10] sm:$0xff] %v444_v32  ;;  %v450_v35 = vld [vmem:[%s893_s18 + $0x28] sm:$0xff]  ;;  %447 = vst [vmem:[%s889_s12 + $0x18] sm:$0xff] %v446_v33  ;;  %v452_v36 = vld [vmem:[%s893_s18 + $0x30] sm:$0xff] }
 0x120   : >> { %449 = vst [vmem:[%s889_s12 + $0x20] sm:$0xff] %v448_v34  ;;  %451 = vst [vmem:[%s889_s12 + $0x28] sm:$0xff] %v450_v35  ;;  %v454_v37 = vld [vmem:[%s893_s18 + $0x38] sm:$0xff]  ;;  %v456_v38 = vld [vmem:[%s893_s18 + $0x40] sm:$0xff]  ;;  %s1084_s21 = smov (%p459_p8, %s458_s21), 0  ;;  %436 = sbr.rel (!%p433_p9) target bundleno = 285 (0x11d), region = 123 }
 0x121   : >> { %453 = vst [vmem:[%s889_s12 + $0x30] sm:$0xff] %v452_v36  ;;  %455 = vst [vmem:[%s889_s12 + $0x38] sm:$0xff] %v454_v37  ;;  %s461_s22 = smul.u32 72, %s1084_s21  ;;  %s1077_s19 = smov %s1084_s21 }
 0x122   : >> { %457 = vst [vmem:[%s889_s12 + $0x40] sm:$0xff] %v456_v38 }
 0x123   : >> { %s463_s18 = scalar_lea.vmem %s1000_s6, %s461_s22 [#allocation4]   ;;  %s464_s12 = scalar_lea.vmem %s1018_s14, %s461_s22  }
 0x125 PF: > { %799 = sdivrem.u32 %s1082_s7, 9 }
 0x126   : > { %s630_s23 = smul.u32 72, %s1024_s17 }
 0x128   : > { %s469_s24 = scalar_lea.vmem %s1000_s6, %s630_s23 [#allocation4]   ;;  %s471_s25 = scalar_lea.vmem %s1018_s14, %s630_s23  }
 0x12e   : > { %s800_s26 = spop.drf %799 }
 0x12f   : > { %p632_p10 = scmp.le.s32.totalorder %s800_s26, 0 }
 0x130   : > { %s903_s27 = smov (!%p632_p10), %s471_s25   ;;  %s907_s28 = smov (!%p632_p10), %s469_s24  }
 0x131   : > { %565 = sbr.rel (%p632_p10) target bundleno = 318 (0x13e), region = 128  ;;  %s911_s29 = smov (!%p632_p10), 0  }
 0x132   : > { %s915_s30 = smov (!%p632_p10), 0  }
 0x136 LB: >> { %v481_v39 = vld [vmem:[%s909_s28] sm:$0xff]  ;;  %s483_s3 = sadd.s32 1, %s913_s29  ;;  %s475_s30 = sadd.s32 1, %s917_s30   ;;  %s917_s30 = sphi %s915_s30, %s475_s30   ;;  %s913_s29 = sphi %s911_s29, %s912_s29   ;;  %s909_s28 = sphi %s907_s28, %s488_s28   ;;  %s905_s27 = sphi %s903_s27, %s489_s27  }
 0x137   : >> { %482 = vst [vmem:[%s905_s27] sm:$0xff] %v481_v39  ;;  %p484_p11 = scmp.ge.s32.totalorder %s483_s3, %s800_s26  ;;  %p474_p12 = scmp.ge.s32.totalorder %s475_s30, %s800_s26 }
 0x139   : >> { %s1086_s3 = smov (%p484_p11, %s483_s3), 0  ;;  %477 = sbr.rel (!%p474_p12) target bundleno = 310 (0x136), region = 134 }
 0x13a   : >> { %s633_s4 = sshll.u32 %s1086_s3, 3  ;;  %s912_s29 = smov %s1086_s3  }
 0x13b   : >> { %s488_s28 = scalar_lea.vmem %s469_s24, %s633_s4 [#allocation4]   ;;  %s489_s27 = scalar_lea.vmem %s471_s25, %s633_s4  }
 0x13e PF: > { %p10_p13 = scmp.ge.s32.totalorder %s954_s13, 4   ;;  %s1078_s9 = smov %s881_s10 }
 0x13f   : > { %s1079_s10 = smov %s962_s16  ;;  %s1080_s11 = smov %s954_s13 }
 0x140   :  { %12 = sbr.rel (!%p10_p13) target bundleno = 2 (0x2), region = 145 }
 0x145   :  { %505 = vsyncpa [#allocation3], 1 }
 0x146   :  { %507 = vsyncpa [#allocation3 + $0x1], 1 }

// kernel: _lambda_.5
= control target key start
LH: loop header
LB: loop body
LE: loop exit
PB: predicated region body
PF: predicated region fallthrough
CT: control target
= control target key end

     0   :  { %s1647_s21 = smov 0   ;;  %s1649_s22 = smov 0   ;;  %s1984_s0 = inlined_call_operand.vmem [shape: f32[66,130], index: 0, kind: input, shape index: {}]   ;;  %s1985_s1 = inlined_call_operand.vmem [shape: f32[66,130], index: 1, kind: input, shape index: {}]   ;;  %s1986_s2 = inlined_call_operand.vmem [shape: f32[66,130], index: 2, kind: input, shape index: {}]   ;;  %s1987_s3 = inlined_call_operand.vmem [shape: f32[1,130], index: 3, kind: input, shape index: {}]   ;;  %s1988_s4 = inlined_call_operand.vmem [shape: f32[66,1], index: 4, kind: input, shape index: {}]   ;;  %s1989_s5 = inlined_call_operand.vmem [shape: f32[66,130], index: 5, kind: output, shape index: {0}]   ;;  %s1990_s6 = inlined_call_operand.vmem [shape: f32[66,130], index: 6, kind: output, shape index: {1}]  }
   0x1   :  { %s1651_s23 = smov 0   ;;  %s1653_s24 = smov 0  }
   0x2   :  { %s1655_s25 = smov 0  }
   0x3 LB: > { %s1131_s26 = sadd.s32 4294967295, %s1545_s25   ;;  %s29_s27 = sadd.s32 1, %s1541_s24  ;;  %s1545_s25 = sphi %s1655_s25, %s17_s25   ;;  %s1541_s24 = sphi %s1653_s24, %s2007_s24   ;;  %s1537_s23 = sphi %s1651_s23, %s2006_s23   ;;  %s1533_s22 = sphi %s1649_s22, %s2005_s22   ;;  %s1529_s21 = sphi %s1647_s21, %s2004_s21  }
   0x4   : > { %p31_p0 = scmp.ge.s32.totalorder %s29_s27, 2  ;;  %s174_s28 = sadd.s32 1, %s1533_s22 }
   0x5   : > { %p184_p1 = scmp.ne.s32.totalorder %s1533_s22, %s1529_s21  ;;  %p185_p2 = scmp.eq.s32.totalorder %s1131_s26, 1 }
   0x6   : > { %s2009_s27 = smov (%p31_p0, %s29_s27), 0  ;;  %p1136_p4 = scmp.ge.s32.totalorder %s1545_s25, 1 }
   0x7   : > { %p1679_p3 = por %p185_p2, %p184_p1  ;;  %s169_s30 = ssub.s32 %s1541_s24, %s2009_s27 }
   0x8   : > { %p337_p5 = scmp.lt.s32.totalorder %s1545_s25, 3  ;;  %p172_p6 = scmp.eq.s32.totalorder %s169_s30, 0 }
   0xa   : > { %p338_p7 = pnand %p1136_p4, %p337_p5 }
   0xb   : > { %s1688_s7 = scalar_select %p172_p6, %s1533_s22, %s174_s28  }
   0xc   : > { %341 = sbr.rel (%p338_p7) target bundleno = 303 (0x12f), region = 40  ;;  %s414_s12 = sand.u32 (!%p338_p7), 1, %s1529_s21  }
   0xd   : > { %s1691_s8 = smul.u32 (!%p338_p7), 5, %s1537_s23 }
   0xe   : > { %s1719_s30 = smul.u32 (!%p338_p7), 80, %s414_s12 }
   0xf   : > { %p430_p8 = scmp.lt.s32.totalorder (!%p338_p7), %s1691_s8, 8 }
  0x10   : > { %s1730_s9 = scalar_lea.vmem (!%p338_p7), [#allocation2], %s1719_s30  }
  0x11   : > { %v522_v0 = vld [vmem:[%s1987_s3] sm:$0x3]  ;;  %v634_v1 = vlaneseq  ;;  %v1611_v2 = vmov 0   ;;  %s431_s11 = scalar_select %p430_p8, %s1691_s8, 8 }
  0x12   : > { %1434 = vset.pattern.permute.xlu1 %v1611_v2  ;;  %1433 = vset.pattern.permute.xlu0 %v1611_v2  ;;  %v654_v4 = vsub.f32 1.0, %v522_v0  ;;  %s1179_s15 = smul.u32 (%p1679_p3), 80, %s1537_s23 }
  0x13   : > { %v635_v3 = vshrl.u32 %v634_v1, 7  ;;  %s1143_s13 = sshll.u32 %s431_s11, 3  ;;  %s1699_s14 = sshll.u32 %s431_s11, 4 }
  0x14   : > { %s1704_s17 = scalar_lea.vmem %s1988_s4, %s1143_s13  ;;  %s1710_s20 = scalar_lea.vmem %s1984_s0, %s1699_s14 }
  0x15   : > { %v636_v5 = vsub.s32 0, %v635_v3  ;;  %v640_v6 = vsub.s32 1, %v635_v3  ;;  %v525_v11 = vld [vmem:[%s1704_s17 + $0x10] sm:$0xff]  ;;  %s459_s28 = scalar_lea.vmem %s1985_s1, %s1699_s14  ;;  %v655_v12 = vld [vmem:[%s1710_s20] sm:$0xff]  ;;  %v656_v13 = vld [vmem:[%s1710_s20 + $0x8] sm:$0xff]  ;;  %s1750_s12 = scalar_lea.vmem %s1986_s2, %s1699_s14 }
  0x16   : > { %550 = vperm.xlu1 %1434, %v525_v11   ;;  %v623_v14 = vld [vmem:[%s459_s28] sm:$0xff]  ;;  %v624_v15 = vld [vmem:[%s459_s28 + $0x8] sm:$0xff]  ;;  %v625_v16 = vld [vmem:[%s459_s28 + $0x10] sm:$0xff]  ;;  %s1806_s13 = scalar_lea.vmem [#allocation3], %s1719_s30   ;;  %s729_s14 = ssub.s32 (%p1679_p3), 9, %s1691_s8 }
  0x17   : > { %v637_v7 = vrot.slane %v522_v0, %v636_v5  ;;  %v641_v8 = vrot.slane %v522_v0, %v640_v6  ;;  %v669_v9 = vrot.slane %v654_v4, %v636_v5  ;;  %v673_v10 = vrot.slane %v654_v4, %v640_v6  ;;  %v626_v19 = vld [vmem:[%s459_s28 + $0x18] sm:$0xff]  ;;  %v627_v20 = vld [vmem:[%s459_s28 + $0x20] sm:$0xff]  ;;  %v628_v21 = vld [vmem:[%s459_s28 + $0x28] sm:$0xff]  ;;  %p730_p9 = scmp.lt.s32.totalorder (%p1679_p3), %s729_s14, 5  ;;  %s1862_s18 = scalar_lea.vmem (%p1679_p3), %s1989_s5, %s1179_s15  }
  0x18   : > { %v629_v24 = vld [vmem:[%s459_s28 + $0x30] sm:$0xff]  ;;  %v630_v25 = vld [vmem:[%s459_s28 + $0x38] sm:$0xff]  ;;  %v631_v26 = vld [vmem:[%s459_s28 + $0x40] sm:$0xff] }
  0x19   : > { %v676_v17 = vmul.f32 %v669_v9, %v655_v12  ;;  %v677_v18 = vmul.f32 %v673_v10, %v656_v13  ;;  %v644_v22 = vmul.f32 %v637_v7, %v623_v14  ;;  %v645_v23 = vmul.f32 %v641_v8, %v624_v15  ;;  %v632_v31 = vld [vmem:[%s459_s28 + $0x48] sm:$0xff]  ;;  %v657_v35 = vld [vmem:[%s1710_s20 + $0x10] sm:$0xff]  ;;  %v658_v36 = vld [vmem:[%s1710_s20 + $0x18] sm:$0xff] }
  0x1a   : > { %v646_v27 = vmul.f32 %v637_v7, %v625_v16  ;;  %v647_v28 = vmul.f32 %v641_v8, %v626_v19  ;;  %v648_v29 = vmul.f32 %v637_v7, %v627_v20  ;;  %v649_v30 = vmul.f32 %v641_v8, %v628_v21  ;;  %v659_v39 = vld [vmem:[%s1710_s20 + $0x20] sm:$0xff]  ;;  %v660_v40 = vld [vmem:[%s1710_s20 + $0x28] sm:$0xff]  ;;  %v661_v41 = vld [vmem:[%s1710_s20 + $0x30] sm:$0xff] }
  0x1b   : > { %v650_v32 = vmul.f32 %v637_v7, %v629_v24  ;;  %v651_v33 = vmul.f32 %v641_v8, %v630_v25  ;;  %v652_v34 = vmul.f32 %v637_v7, %v631_v26  ;;  %v686_v37 = vadd.f32 %v676_v17, %v644_v22  ;;  %v662_v45 = vld [vmem:[%s1710_s20 + $0x38] sm:$0xff]  ;;  %v663_v46 = vld [vmem:[%s1710_s20 + $0x40] sm:$0xff]  ;;  %v664_v47 = vld [vmem:[%s1710_s20 + $0x48] sm:$0xff] }
  0x1c   : > { %v653_v38 = vmul.f32 %v641_v8, %v632_v31  ;;  %v678_v42 = vmul.f32 %v669_v9, %v657_v35  ;;  %v679_v43 = vmul.f32 %v673_v10, %v658_v36  ;;  %v687_v44 = vadd.f32 %v677_v18, %v645_v23  ;;  %v523_v55 = vld [vmem:[%s1704_s17] sm:$0xff]  ;;  %v526_v56 = vld [vmem:[%s1704_s17 + $0x18] sm:$0xff]  ;;  %v524_v0 = vld [vmem:[%s1704_s17 + $0x8] sm:$0xff] }
  0x1d   : > { %v680_v48 = vmul.f32 %v669_v9, %v659_v39  ;;  %v681_v49 = vmul.f32 %v673_v10, %v660_v40  ;;  %v682_v50 = vmul.f32 %v669_v9, %v661_v41  ;;  %696 = vst [vmem:[%s1730_s9] sm:$0xff] %v686_v37  ;;  %v683_v51 = vmul.f32 %v673_v10, %v662_v45  ;;  %v527_v1 = vld [vmem:[%s1704_s17 + $0x20] sm:$0xff]  ;;  %v533_v3 = vld [vmem:[%s1750_s12 + $0x28] sm:$0xff]  ;;  %v534_v14 = vld [vmem:[%s1750_s12 + $0x30] sm:$0xff] }
  0x1e   : > { %v684_v52 = vmul.f32 %v669_v9, %v663_v46  ;;  %v685_v53 = vmul.f32 %v673_v10, %v664_v47  ;;  %v688_v54 = vadd.f32 %v678_v42, %v646_v27  ;;  %697 = vst [vmem:[%s1730_s9 + $0x8] sm:$0xff] %v687_v44  ;;  %v689_v57 = vadd.f32 %v679_v43, %v647_v28  ;;  %v532_v2 = vld [vmem:[%s1750_s12 + $0x20] sm:$0xff]  ;;  %v529_v12 = vld [vmem:[%s1750_s12 + $0x8] sm:$0xff]  ;;  %v535_v15 = vld [vmem:[%s1750_s12 + $0x38] sm:$0xff] }
  0x1f   : > { %v690_v58 = vadd.f32 %v680_v48, %v648_v29  ;;  %v691_v59 = vadd.f32 %v681_v49, %v649_v30  ;;  %v692_v60 = vadd.f32 %v682_v50, %v650_v32  ;;  %540 = vperm.xlu0 %1433, %v523_v55   ;;  %v693_v61 = vadd.f32 %v683_v51, %v651_v33  ;;  %v528_v11 = vld [vmem:[%s1750_s12] sm:$0xff] }
  0x20   : > { %v694_v62 = vadd.f32 %v684_v52, %v652_v34  ;;  %v695_v63 = vadd.f32 %v685_v53, %v653_v38  ;;  %555 = vperm.xlu1 %1434, %v526_v56   ;;  %698 = vst [vmem:[%s1730_s9 + $0x10] sm:$0xff] %v688_v54  ;;  %699 = vst [vmem:[%s1730_s9 + $0x18] sm:$0xff] %v689_v57 }
  0x21   : > { %700 = vst [vmem:[%s1730_s9 + $0x20] sm:$0xff] %v690_v58  ;;  %701 = vst [vmem:[%s1730_s9 + $0x28] sm:$0xff] %v691_v59  ;;  %v530_v58 = vld [vmem:[%s1750_s12 + $0x10] sm:$0xff] }
  0x22   : > { %702 = vst [vmem:[%s1730_s9 + $0x30] sm:$0xff] %v692_v60  ;;  %703 = vst [vmem:[%s1730_s9 + $0x38] sm:$0xff] %v693_v61 }
  0x23   : > { %704 = vst [vmem:[%s1730_s9 + $0x40] sm:$0xff] %v694_v62  ;;  %705 = vst [vmem:[%s1730_s9 + $0x48] sm:$0xff] %v695_v63  ;;  %545 = vperm.xlu0 %1433, %v524_v0   ;;  %v531_v63 = vld [vmem:[%s1750_s12 + $0x18] sm:$0xff] }
  0x27   : > { %560 = vperm.xlu0 %1433, %v527_v1   ;;  %v536_v1 = vld [vmem:[%s1750_s12 + $0x40] sm:$0xff] }
  0x91   : > { %v1754_v4 = vpop.permute.xlu1 %550 }
  0x92   : > { %v567_v5 = vsub.f32 %v532_v2, %v1754_v4  ;;  %v568_v6 = vsub.f32 %v533_v3, %v1754_v4 }
  0x94   : > { %v577_v7 = vmul.f32 0.15915494, %v567_v5  ;;  %v578_v8 = vmul.f32 0.15915494, %v568_v6 }
  0x96   : > { %v1214_v9 = vand.u32 2147483647, %v577_v7  ;;  %v1216_v10 = vcvt.f32.s32 %v577_v7  ;;  %v1224_v13 = vcvt.f32.s32 %v578_v8  ;;  %v1219_v17 = vand.u32 2147483648, %v577_v7 }
  0x97   : > { %v1222_v18 = vand.u32 2147483647, %v578_v8  ;;  %v1227_v21 = vand.u32 2147483648, %v578_v8 }
  0x98   : > { %v1217_v16 = vcvt.s32.f32 %v1216_v10  ;;  %v1225_v20 = vcvt.s32.f32 %v1224_v13  ;;  %vm1772_vm0 = vcmp.lt.f32.partialorder %v1214_v9, 8388608.0  ;;  %v537_v13 = vld [vmem:[%s1750_s12 + $0x48] sm:$0xff] }
  0x99   : > { %vm1223_vm1 = vcmp.lt.f32.partialorder %v1222_v18, 8388608.0 }
  0x9a   : > { %v1762_v19 = vpop.permute.xlu0 %540  ;;  %v1218_v26 = vand.u32 2147483647, %v1217_v16  ;;  %v1226_v29 = vand.u32 2147483647, %v1225_v20 }
  0x9b   : > { %v1765_v22 = vsub.f32 %v528_v11, %v1762_v19  ;;  %v1768_v23 = vsub.f32 %v529_v12, %v1762_v19  ;;  %v1770_v24 = vpop.permute.xlu1 %555 }
  0x9c   : > { %v1777_v27 = vsub.f32 %v534_v14, %v1770_v24  ;;  %v1780_v28 = vsub.f32 %v535_v15, %v1770_v24  ;;  %v1220_v32 = vor.u32 %v1219_v17, %v1218_v26  ;;  %v1228_v33 = vor.u32 %v1227_v21, %v1226_v29 }
  0x9d   : > { %v573_v30 = vmul.f32 0.15915494, %v1765_v22  ;;  %v574_v31 = vmul.f32 0.15915494, %v1768_v23 }
  0x9e   : > { %v579_v36 = vmul.f32 0.15915494, %v1777_v27  ;;  %v1785_v37 = vpop.permute.xlu0 %545  ;;  %v1221_v38 = vsel %vm1772_vm0, %v1220_v32, %v577_v7  ;;  %v580_v41 = vmul.f32 0.15915494, %v1780_v28  ;;  %v1229_v42 = vsel %vm1223_vm1, %v1228_v33, %v578_v8 }
  0x9f   : > { %v1182_v34 = vand.u32 2147483647, %v573_v30  ;;  %v1184_v35 = vcvt.f32.s32 %v573_v30  ;;  %v1190_v39 = vand.u32 2147483647, %v574_v31  ;;  %v1192_v40 = vcvt.f32.s32 %v574_v31 }
  0xa0   : > { %v597_v43 = vmul.f32 6.2831855, %v1221_v38  ;;  %v1187_v45 = vand.u32 2147483648, %v573_v30  ;;  %v598_v46 = vmul.f32 6.2831855, %v1229_v42  ;;  %v1195_v49 = vand.u32 2147483648, %v574_v31 }
  0xa1   : > { %v1185_v44 = vcvt.s32.f32 %v1184_v35  ;;  %vm1790_vm2 = vcmp.lt.f32.partialorder %v1182_v34, 8388608.0  ;;  %v1193_v48 = vcvt.s32.f32 %v1192_v40  ;;  %vm1794_vm3 = vcmp.lt.f32.partialorder %v1190_v39, 8388608.0 }
  0xa2   : > { %v607_v50 = vsub.f32 %v567_v5, %v597_v43  ;;  %v1232_v53 = vcvt.f32.s32 %v579_v36  ;;  %v608_v54 = vsub.f32 %v568_v6, %v598_v46  ;;  %v1230_v56 = vand.u32 2147483647, %v579_v36  ;;  %v1801_v0 = vpop.permute.xlu0 %560 }
  0xa3   : > { %v1186_v51 = vand.u32 2147483647, %v1185_v44  ;;  %v1194_v55 = vand.u32 2147483647, %v1193_v48  ;;  %v1235_v57 = vand.u32 2147483648, %v579_v36  ;;  %v1240_v62 = vcvt.f32.s32 %v580_v41 }
  0xa4   : > { %v617_v59 = vadd.f32 %v607_v50, %v1754_v4  ;;  %v1233_v61 = vcvt.s32.f32 %v1232_v53  ;;  %v618_v2 = vadd.f32 %v608_v54, %v1754_v4  ;;  %v1238_v5 = vand.u32 2147483647, %v580_v41 }
  0xa5   : > { %v1188_v60 = vor.u32 %v1187_v45, %v1186_v51  ;;  %v1196_v3 = vor.u32 %v1195_v49, %v1194_v55  ;;  %v1243_v6 = vand.u32 2147483648, %v580_v41  ;;  %v1241_v9 = vcvt.s32.f32 %v1240_v62 }
  0xa6   : > { %710 = vst [vmem:[%s1806_s13 + $0x20] sm:$0xff] %v617_v59  ;;  %v1234_v8 = vand.u32 2147483647, %v1233_v61  ;;  %v1812_v10 = vsub.f32 %v530_v58, %v1785_v37  ;;  %711 = vst [vmem:[%s1806_s13 + $0x28] sm:$0xff] %v618_v2  ;;  %v1818_v12 = vsub.f32 %v531_v63, %v1785_v37  ;;  %v1822_v14 = vsub.f32 %v536_v1, %v1801_v0 }
  0xa7   : > { %v1189_v7 = vsel %vm1790_vm2, %v1188_v60, %v573_v30  ;;  %v1197_v4 = vsel %vm1794_vm3, %v1196_v3, %v574_v31  ;;  %v1242_v17 = vand.u32 2147483647, %v1241_v9  ;;  %vm1231_vm4 = vcmp.lt.f32.partialorder %v1230_v56, 8388608.0 }
  0xa8   : > { %v593_v11 = vmul.f32 6.2831855, %v1189_v7  ;;  %v594_v15 = vmul.f32 6.2831855, %v1197_v4  ;;  %v1236_v16 = vor.u32 %v1235_v57, %v1234_v8  ;;  %v575_v18 = vmul.f32 0.15915494, %v1812_v10 }
  0xa9   : > { %v576_v21 = vmul.f32 0.15915494, %v1818_v12  ;;  %v1244_v29 = vor.u32 %v1243_v6, %v1242_v17  ;;  %v1829_v30 = vsub.f32 %v537_v13, %v1801_v0  ;;  %vm1239_vm5 = vcmp.lt.f32.partialorder %v1238_v5, 8388608.0 }
  0xaa   : > { %v603_v20 = vsub.f32 %v1765_v22, %v593_v11  ;;  %v604_v25 = vsub.f32 %v1768_v23, %v594_v15  ;;  %v1237_v26 = vsel %vm1231_vm4, %v1236_v16, %v579_v36  ;;  %v1200_v33 = vcvt.f32.s32 %v575_v18 }
  0xab   : > { %v599_v32 = vmul.f32 6.2831855, %v1237_v26  ;;  %v1245_v35 = vsel %vm1239_vm5, %v1244_v29, %v580_v41  ;;  %v1198_v22 = vand.u32 2147483647, %v575_v18  ;;  %v581_v38 = vmul.f32 0.15915494, %v1822_v14 }
  0xac   : > { %v613_v31 = vadd.f32 %v603_v20, %v1762_v19  ;;  %v614_v34 = vadd.f32 %v604_v25, %v1762_v19  ;;  %v600_v23 = vmul.f32 6.2831855, %v1245_v35  ;;  %v1201_v39 = vcvt.s32.f32 %v1200_v33 }
  0xad   : > { %v609_v36 = vsub.f32 %v1777_v27, %v599_v32  ;;  %v1208_v40 = vcvt.f32.s32 %v576_v21  ;;  %v1203_v42 = vand.u32 2147483648, %v575_v18  ;;  %v1206_v43 = vand.u32 2147483647, %v576_v21 }
  0xae   : > { %706 = vst [vmem:[%s1806_s13] sm:$0xff] %v613_v31  ;;  %707 = vst [vmem:[%s1806_s13 + $0x8] sm:$0xff] %v614_v34  ;;  %v582_v44 = vmul.f32 0.15915494, %v1829_v30  ;;  %v610_v45 = vsub.f32 %v1780_v28, %v600_v23  ;;  %v1202_v41 = vand.u32 2147483647, %v1201_v39  ;;  %v1211_v47 = vand.u32 2147483648, %v576_v21 }
  0xaf   : > { %v619_v19 = vadd.f32 %v609_v36, %v1770_v24  ;;  %v1209_v46 = vcvt.s32.f32 %v1208_v40  ;;  %v1248_v48 = vcvt.f32.s32 %v581_v38  ;;  %vm1199_vm6 = vcmp.lt.f32.partialorder %v1198_v22, 8388608.0 }
  0xb0   : > { %v620_v49 = vadd.f32 %v610_v45, %v1770_v24  ;;  %v1204_v27 = vor.u32 %v1203_v42, %v1202_v41  ;;  %v1256_v51 = vcvt.f32.s32 %v582_v44  ;;  %vm1207_vm7 = vcmp.lt.f32.partialorder %v1206_v43, 8388608.0 }
  0xb1   : > { %712 = vst [vmem:[%s1806_s13 + $0x30] sm:$0xff] %v619_v19  ;;  %v1210_v50 = vand.u32 2147483647, %v1209_v46  ;;  %v1246_v52 = vand.u32 2147483647, %v581_v38  ;;  %v1249_v53 = vcvt.s32.f32 %v1248_v48  ;;  %v1251_v28 = vand.u32 2147483648, %v581_v38 }
  0xb2   : > { %713 = vst [vmem:[%s1806_s13 + $0x38] sm:$0xff] %v620_v49  ;;  %v1205_v54 = vsel %vm1199_vm6, %v1204_v27, %v575_v18  ;;  %v1257_v56 = vcvt.s32.f32 %v1256_v51  ;;  %v1254_v59 = vand.u32 2147483647, %v582_v44  ;;  %v1259_v24 = vand.u32 2147483648, %v582_v44 }
  0xb3   : > { %v1212_v55 = vor.u32 %v1211_v47, %v1210_v50  ;;  %v595_v57 = vmul.f32 6.2831855, %v1205_v54  ;;  %v1250_v58 = vand.u32 2147483647, %v1249_v53  ;;  %vm1247_vm8 = vcmp.lt.f32.partialorder %v1246_v52, 8388608.0 }
  0xb4   : > { %v1258_v61 = vand.u32 2147483647, %v1257_v56  ;;  %vm1255_vm9 = vcmp.lt.f32.partialorder %v1254_v59, 8388608.0 }
  0xb5   : > { %v1213_v60 = vsel %vm1207_vm7, %v1212_v55, %v576_v21  ;;  %v605_v63 = vsub.f32 %v1812_v10, %v595_v57  ;;  %v1252_v1 = vor.u32 %v1251_v28, %v1250_v58 }
  0xb6   : > { %v596_v62 = vmul.f32 6.2831855, %v1213_v60  ;;  %v1260_v2 = vor.u32 %v1259_v24, %v1258_v61 }
  0xb7   : > { %v615_v5 = vadd.f32 %v605_v63, %v1785_v37  ;;  %v1253_v6 = vsel %vm1247_vm8, %v1252_v1, %v581_v38 }
  0xb8   : > { %v606_v3 = vsub.f32 %v1818_v12, %v596_v62  ;;  %v1261_v7 = vsel %vm1255_vm9, %v1260_v2, %v582_v44  ;;  %v601_v8 = vmul.f32 6.2831855, %v1253_v6 }
  0xb9   : > { %708 = vst [vmem:[%s1806_s13 + $0x10] sm:$0xff] %v615_v5  ;;  %v602_v4 = vmul.f32 6.2831855, %v1261_v7 }
  0xba   : > { %v616_v9 = vadd.f32 %v606_v3, %v1785_v37  ;;  %v611_v11 = vsub.f32 %v1822_v14, %v601_v8 }
  0xbb   : > { %v612_v10 = vsub.f32 %v1829_v30, %v602_v4  ;;  %726 = sbr.rel (!%p1679_p3) target bundleno = 245 (0xf5), region = 44 }
  0xbc   : > { %709 = vst [vmem:[%s1806_s13 + $0x18] sm:$0xff] %v616_v9  ;;  %v621_v13 = vadd.f32 %v611_v11, %v1801_v0 }
  0xbd   : > { %v622_v15 = vadd.f32 %v612_v10, %v1801_v0 }
  0xbe   : > { %714 = vst [vmem:[%s1806_s13 + $0x40] sm:$0xff] %v621_v13 }
  0xbf   : > { %715 = vst [vmem:[%s1806_s13 + $0x48] sm:$0xff] %v622_v15 }
  0xc0   : > { %s2011_s14 = smov (!%p730_p9, %s729_s14), 5 }
  0xc1   : > { %s1173_s19 = sshll.u32 %s2011_s14, 8 }
  0xc2   : > { %p1149_p10 = scmp.eq.s32.totalorder %s1173_s19, 0 }
  0xc3   : > { %1435 = sdivrem.u32 (!%p1149_p10), %s2011_s14, 5 }
  0xc4   : > { %741 = sbr.rel (%p1149_p10) target bundleno = 245 (0xf5), region = 48 }
  0xcc   : > { %s1868_s20 = spop.drf %1435 }
  0xcd   : > { %p1150_p11 = scmp.le.s32.totalorder %s1868_s20, 0 }
  0xce   : > { %s1998_s21 = smov (!%p1150_p11), %s1862_s18  ;;  %s1999_s26 = smov (!%p1150_p11), %s1730_s9 }
  0xcf   : > { %1015 = sbr.rel (%p1150_p11) target bundleno = 220 (0xdc), region = 152  ;;  %s1877_s28 = smov (!%p1150_p11), 0  }
  0xd0   : > { %s1879_s30 = smov (!%p1150_p11), 0  }
  0xd4 LB: >> { %v755_v37 = vld [vmem:[%s1553_s26] sm:$0xff]  ;;  %v757_v0 = vld [vmem:[%s1553_s26 + $0x10] sm:$0xff]  ;;  %s775_s10 = sadd.s32 1, %s1557_s28  ;;  %v765_v17 = vld [vmem:[%s1553_s26 + $0x8] sm:$0xff]  ;;  %s749_s30 = sadd.s32 1, %s1561_s30   ;;  %s1561_s30 = sphi %s1879_s30, %s749_s30   ;;  %s1557_s28 = sphi %s1877_s28, %s2000_s28   ;;  %s1553_s26 = sphi %s1999_s26, %s780_s26   ;;  %s1549_s21 = sphi %s1998_s21, %s781_s21  }
  0xd5   : >> { %v759_v12 = vld [vmem:[%s1553_s26 + $0x20] sm:$0xff]  ;;  %756 = vst [vmem:[%s1549_s21] sm:$0xff] %v755_v37  ;;  %758 = vst [vmem:[%s1549_s21 + $0x10] sm:$0xff] %v757_v0  ;;  %v761_v14 = vld [vmem:[%s1553_s26 + $0x30] sm:$0xff]  ;;  %p776_p12 = scmp.ge.s32.totalorder %s775_s10, %s1868_s20  ;;  %p748_p13 = scmp.ge.s32.totalorder %s749_s30, %s1868_s20 }
  0xd6   : >> { %760 = vst [vmem:[%s1549_s21 + $0x20] sm:$0xff] %v759_v12  ;;  %v763_v16 = vld [vmem:[%s1553_s26 + $0x40] sm:$0xff]  ;;  %762 = vst [vmem:[%s1549_s21 + $0x30] sm:$0xff] %v761_v14  ;;  %v767_v18 = vld [vmem:[%s1553_s26 + $0x18] sm:$0xff] }
  0xd7   : >> { %764 = vst [vmem:[%s1549_s21 + $0x40] sm:$0xff] %v763_v16  ;;  %766 = vst [vmem:[%s1549_s21 + $0x8] sm:$0xff] %v765_v17  ;;  %v769_v20 = vld [vmem:[%s1553_s26 + $0x28] sm:$0xff]  ;;  %v771_v21 = vld [vmem:[%s1553_s26 + $0x38] sm:$0xff]  ;;  %s2013_s10 = smov (%p776_p12, %s775_s10), 0  ;;  %751 = sbr.rel (!%p748_p13) target bundleno = 212 (0xd4), region = 158 }
  0xd8   : >> { %768 = vst [vmem:[%s1549_s21 + $0x18] sm:$0xff] %v767_v18  ;;  %770 = vst [vmem:[%s1549_s21 + $0x28] sm:$0xff] %v769_v20  ;;  %v773_v25 = vld [vmem:[%s1553_s26 + $0x48] sm:$0xff]  ;;  %s778_s11 = smul.u32 80, %s2013_s10  ;;  %s2000_s28 = smov %s2013_s10 }
  0xd9   : >> { %772 = vst [vmem:[%s1549_s21 + $0x38] sm:$0xff] %v771_v21  ;;  %774 = vst [vmem:[%s1549_s21 + $0x48] sm:$0xff] %v773_v25 }
  0xda   : >> { %s780_s26 = scalar_lea.vmem %s1730_s9, %s778_s11 [#allocation2]   ;;  %s781_s21 = scalar_lea.vmem %s1862_s18, %s778_s11  }
  0xdc PF: > { %1437 = sdivrem.u32 %s2011_s14, 5 }
  0xdd   : > { %s1151_s12 = smul.u32 80, %s1868_s20 }
  0xdf   : > { %s1903_s15 = scalar_lea.vmem %s1730_s9, %s1151_s12 [#allocation2]   ;;  %s1906_s16 = scalar_lea.vmem %s1862_s18, %s1151_s12  }
  0xe5   : > { %s1438_s17 = spop.drf %1437 }
  0xe6   : > { %p1153_p0 = scmp.le.s32.totalorder %s1438_s17, 0 }
  0xe7   : > { %s1563_s19 = smov (!%p1153_p0), %s1906_s16   ;;  %s1567_s10 = smov (!%p1153_p0), %s1903_s15  }
  0xe8   : > { %1029 = sbr.rel (%p1153_p0) target bundleno = 245 (0xf5), region = 163  ;;  %s1571_s30 = smov (!%p1153_p0), 0  }
  0xe9   : > { %s1575_s11 = smov (!%p1153_p0), 0  }
  0xed LB: >> { %v798_v26 = vld [vmem:[%s1569_s10] sm:$0xff]  ;;  %v800_v29 = vld [vmem:[%s1569_s10 + $0x8] sm:$0xff]  ;;  %s802_s9 = sadd.s32 1, %s1573_s30  ;;  %s792_s11 = sadd.s32 1, %s1577_s11   ;;  %s1577_s11 = sphi %s1575_s11, %s792_s11   ;;  %s1573_s30 = sphi %s1571_s30, %s1572_s30   ;;  %s1569_s10 = sphi %s1567_s10, %s807_s10   ;;  %s1565_s19 = sphi %s1563_s19, %s808_s19  }
  0xee   : >> { %799 = vst [vmem:[%s1565_s19] sm:$0xff] %v798_v26  ;;  %801 = vst [vmem:[%s1565_s19 + $0x8] sm:$0xff] %v800_v29  ;;  %p803_p1 = scmp.ge.s32.totalorder %s802_s9, %s1438_s17  ;;  %p791_p2 = scmp.ge.s32.totalorder %s792_s11, %s1438_s17 }
  0xf0   : >> { %s2015_s9 = smov (%p803_p1, %s802_s9), 0  ;;  %794 = sbr.rel (!%p791_p2) target bundleno = 237 (0xed), region = 169 }
  0xf1   : >> { %s1154_s14 = sshll.u32 %s2015_s9, 4  ;;  %s1572_s30 = smov %s2015_s9  }
  0xf2   : >> { %s807_s10 = scalar_lea.vmem %s1903_s15, %s1154_s14 [#allocation2]   ;;  %s808_s19 = scalar_lea.vmem %s1906_s16, %s1154_s14  }
  0xf5 PF: > { %814 = sbr.rel (!%p1679_p3) target bundleno = 303 (0x12f), region = 74  ;;  %s817_s18 = ssub.s32 (%p1679_p3), 9, %s1691_s8 }
  0xf6   : > { %s1180_s20 = smul.u32 (%p1679_p3), 80, %s1537_s23  ;;  %p818_p4 = scmp.lt.s32.totalorder (%p1679_p3), %s817_s18, 5 }
  0xf8   : > { %s1919_s28 = scalar_lea.vmem (%p1679_p3), %s1990_s6, %s1180_s20  }
  0xfa   : > { %s2017_s18 = smov (!%p818_p4, %s817_s18), 5 }
  0xfb   : > { %s1176_s12 = sshll.u32 %s2017_s18, 8 }
  0xfc   : > { %p1161_p5 = scmp.eq.s32.totalorder %s1176_s12, 0 }
  0xfd   : > { %1439 = sdivrem.u32 (!%p1161_p5), %s2017_s18, 5 }
  0xfe   : > { %829 = sbr.rel (%p1161_p5) target bundleno = 303 (0x12f), region = 78 }
 0x106   : > { %s1925_s29 = spop.drf %1439 }
 0x107   : > { %p1162_p3 = scmp.le.s32.totalorder %s1925_s29, 0 }
 0x108   : > { %s2001_s23 = smov (!%p1162_p3), %s1919_s28  ;;  %s2002_s8 = smov (!%p1162_p3), %s1806_s13 }
 0x109   : > { %1043 = sbr.rel (%p1162_p3) target bundleno = 278 (0x116), region = 174  ;;  %s1934_s15 = smov (!%p1162_p3), 0  }
 0x10a   : > { %s1936_s16 = smov (!%p1162_p3), 0  }
 0x10e LB: >> { %v843_v30 = vld [vmem:[%s1585_s8] sm:$0xff]  ;;  %v845_v31 = vld [vmem:[%s1585_s8 + $0x10] sm:$0xff]  ;;  %s863_s17 = sadd.s32 1, %s1589_s15  ;;  %v853_v35 = vld [vmem:[%s1585_s8 + $0x8] sm:$0xff]  ;;  %s837_s16 = sadd.s32 1, %s1593_s16   ;;  %s1593_s16 = sphi %s1936_s16, %s837_s16   ;;  %s1589_s15 = sphi %s1934_s15, %s2003_s15   ;;  %s1585_s8 = sphi %s2002_s8, %s868_s8   ;;  %s1581_s23 = sphi %s2001_s23, %s869_s23  }
 0x10f   : >> { %v847_v32 = vld [vmem:[%s1585_s8 + $0x20] sm:$0xff]  ;;  %844 = vst [vmem:[%s1581_s23] sm:$0xff] %v843_v30  ;;  %846 = vst [vmem:[%s1581_s23 + $0x10] sm:$0xff] %v845_v31  ;;  %v849_v33 = vld [vmem:[%s1585_s8 + $0x30] sm:$0xff]  ;;  %p864_p6 = scmp.ge.s32.totalorder %s863_s17, %s1925_s29  ;;  %p836_p7 = scmp.ge.s32.totalorder %s837_s16, %s1925_s29 }
 0x110   : >> { %848 = vst [vmem:[%s1581_s23 + $0x20] sm:$0xff] %v847_v32  ;;  %v851_v34 = vld [vmem:[%s1585_s8 + $0x40] sm:$0xff]  ;;  %850 = vst [vmem:[%s1581_s23 + $0x30] sm:$0xff] %v849_v33  ;;  %v855_v22 = vld [vmem:[%s1585_s8 + $0x18] sm:$0xff] }
 0x111   : >> { %852 = vst [vmem:[%s1581_s23 + $0x40] sm:$0xff] %v851_v34  ;;  %854 = vst [vmem:[%s1581_s23 + $0x8] sm:$0xff] %v853_v35  ;;  %v857_v38 = vld [vmem:[%s1585_s8 + $0x28] sm:$0xff]  ;;  %v859_v23 = vld [vmem:[%s1585_s8 + $0x38] sm:$0xff]  ;;  %s2019_s17 = smov (%p864_p6, %s863_s17), 0  ;;  %839 = sbr.rel (!%p836_p7) target bundleno = 270 (0x10e), region = 180 }
 0x112   : >> { %856 = vst [vmem:[%s1581_s23 + $0x18] sm:$0xff] %v855_v22  ;;  %858 = vst [vmem:[%s1581_s23 + $0x28] sm:$0xff] %v857_v38  ;;  %v861_v36 = vld [vmem:[%s1585_s8 + $0x48] sm:$0xff]  ;;  %s866_s19 = smul.u32 80, %s2019_s17  ;;  %s2003_s15 = smov %s2019_s17 }
 0x113   : >> { %860 = vst [vmem:[%s1581_s23 + $0x38] sm:$0xff] %v859_v23  ;;  %862 = vst [vmem:[%s1581_s23 + $0x48] sm:$0xff] %v861_v36 }
 0x114   : >> { %s868_s8 = scalar_lea.vmem %s1806_s13, %s866_s19 [#allocation3]   ;;  %s869_s23 = scalar_lea.vmem %s1919_s28, %s866_s19  }
 0x116 PF: > { %1441 = sdivrem.u32 %s2017_s18, 5 }
 0x117   : > { %s1163_s10 = smul.u32 80, %s1925_s29 }
 0x119   : > { %s1960_s30 = scalar_lea.vmem %s1806_s13, %s1163_s10 [#allocation3]   ;;  %s1963_s11 = scalar_lea.vmem %s1919_s28, %s1163_s10  }
 0x11f   : > { %s1442_s9 = spop.drf %1441 }
 0x120   : > { %p1165_p8 = scmp.le.s32.totalorder %s1442_s9, 0 }
 0x121   : > { %s1595_s14 = smov (!%p1165_p8), %s1963_s11   ;;  %s1599_s20 = smov (!%p1165_p8), %s1960_s30  }
 0x122   : > { %1057 = sbr.rel (%p1165_p8) target bundleno = 303 (0x12f), region = 185  ;;  %s1603_s21 = smov (!%p1165_p8), 0  }
 0x123   : > { %s1607_s26 = smov (!%p1165_p8), 0  }
 0x127 LB: >> { %v886_v39 = vld [vmem:[%s1601_s20] sm:$0xff]  ;;  %v888_v40 = vld [vmem:[%s1601_s20 + $0x8] sm:$0xff]  ;;  %s890_s13 = sadd.s32 1, %s1605_s21  ;;  %s880_s26 = sadd.s32 1, %s1609_s26   ;;  %s1609_s26 = sphi %s1607_s26, %s880_s26   ;;  %s1605_s21 = sphi %s1603_s21, %s1604_s21   ;;  %s1601_s20 = sphi %s1599_s20, %s895_s20   ;;  %s1597_s14 = sphi %s1595_s14, %s896_s14  }
 0x128   : >> { %887 = vst [vmem:[%s1597_s14] sm:$0xff] %v886_v39  ;;  %889 = vst [vmem:[%s1597_s14 + $0x8] sm:$0xff] %v888_v40  ;;  %p891_p9 = scmp.ge.s32.totalorder %s890_s13, %s1442_s9  ;;  %p879_p10 = scmp.ge.s32.totalorder %s880_s26, %s1442_s9 }
 0x12a   : >> { %s2021_s13 = smov (%p891_p9, %s890_s13), 0  ;;  %882 = sbr.rel (!%p879_p10) target bundleno = 295 (0x127), region = 191 }
 0x12b   : >> { %s1166_s18 = sshll.u32 %s2021_s13, 4  ;;  %s1604_s21 = smov %s2021_s13  }
 0x12c   : >> { %s895_s20 = scalar_lea.vmem %s1960_s30, %s1166_s18 [#allocation3]   ;;  %s896_s14 = scalar_lea.vmem %s1963_s11, %s1166_s18  }
 0x12f PF: > { %s17_s25 = sadd.s32 1, %s1545_s25   ;;  %s2004_s21 = smov %s1533_s22 }
 0x130   : > { %p14_p11 = scmp.ge.s32.totalorder %s17_s25, 4   ;;  %s2005_s22 = smov %s1688_s7 }
 0x131   : > { %s2006_s23 = smov %s1541_s24  ;;  %s2007_s24 = smov %s2009_s27 }
 0x132   :  { %16 = sbr.rel (!%p14_p11) target bundleno = 3 (0x3), region = 202 }

// kernel: _lambda_.6
= control target key start
LH: loop header
LB: loop body
LE: loop exit
PB: predicated region body
PF: predicated region fallthrough
CT: control target
= control target key end

     0   :  { %s1023_s9 = smov 0   ;;  %s1025_s10 = smov 0   ;;  %s1221_s0 = inlined_call_operand.vmem [shape: bf16[260,66], index: 0, kind: input, shape index: {}]   ;;  %s1222_s1 = inlined_call_operand.vmem [shape: bf16[66,128], index: 1, kind: input, shape index: {}]   ;;  %s1223_s2 = inlined_call_operand.vmem [shape: f32[260,128], index: 2, kind: output, shape index: {}]  }
   0x1   :  { %s1027_s11 = smov 0  }
   0x2 LB: > { %s1036_s12 = sadd.s32 4294967295, %s972_s11   ;;  %s1038_s13 = sadd.s32 1, %s972_s11   ;;  %s972_s11 = sphi %s1027_s11, %s1230_s11   ;;  %s968_s10 = sphi %s1025_s10, %s1229_s10   ;;  %s964_s9 = sphi %s1023_s9, %s1228_s9  }
   0x3   : > { %s63_s14 = ssub.s32 %s972_s11, %s1038_s13  ;;  %s66_s15 = sadd.s32 1, %s968_s10 }
   0x4   : > { %p64_p0 = scmp.eq.s32.totalorder %s63_s14, 0  ;;  %p76_p1 = scmp.ne.s32.totalorder %s968_s10, %s964_s9 }
   0x5   : > { %p77_p2 = scmp.eq.s32.totalorder %s1036_s12, 1  ;;  %p700_p3 = scmp.ge.s32.totalorder %s972_s11, 1 }
   0x6   : > { %s1046_s16 = scalar_select %p64_p0, %s968_s10, %s66_s15  }
   0x7   : > { %p1048_p4 = por %p77_p2, %p76_p1  ;;  %p121_p5 = scmp.lt.s32.totalorder %s972_s11, 3 }
   0x9   : > { %p122_p6 = pnand %p700_p3, %p121_p5 }
   0xa   : > { %s1059_s22 = smul.u32 (!%p122_p6), 17, %s1036_s12  ;;  %s143_s6 = sand.u32 (!%p122_p6), 1, %s964_s9  }
   0xb   : > { %125 = sbr.rel (%p122_p6) target bundleno = 323 (0x143), region = 28 }
   0xc   : > { %p151_p7 = scmp.lt.s32.totalorder (!%p122_p6), %s1059_s22, 32  ;;  %s808_s7 = smul.u32 (!%p122_p6), 136, %s143_s6 }
   0xe   : > { %s1105_s8 = scalar_lea.vmem (!%p122_p6), [#allocation2], %s808_s7  }
  0x10   : > { %v900_v0 = vld [vmem:[%s1222_s1 + $0x20] ss:$0 sps:$4 sm:$0x11]   ;;  %v1006_v1 = vmov 0.0   ;;  %vm290_vm0 = vcmask 1040384   ;;  %v901_v3 = vld [vmem:[%s1222_s1 + $0x18] sm:$0xff]  }
  0x11   : > { %752 = vmatprep.subr.bf16.mxu0 %v1006_v1  ;;  %798 = vmatprep.subr.bf16.mxu1 %v1006_v1  ;;  %v292_v2 = vsel %vm290_vm0, %v900_v0, 0  ;;  %vm1007_vm1 = vmmov 0   ;;  %v902_v4 = vld [vmem:[%s1222_s1 + $0x10] sm:$0xff]   ;;  %s152_s25 = scalar_select %p151_p7, %s1059_s22, 32  ;;  %v903_v5 = vld [vmem:[%s1222_s1 + $0x8] sm:$0xff]   ;;  %v904_v6 = vld [vmem:[%s1222_s1] sm:$0xff]  }
  0x12   : > { %753 = vmatpush3.bf16.msra.mxu0 %v292_v2  ;;  %803 = vmatpush3.bf16.msra.mxu1 %v292_v2  ;;  %vm262_vm2 = vcmask 539648   ;;  %s423_s9 = ssub.s32 (%p1048_p4), 33, %s1059_s22  ;;  %s737_s11 = smul.u32 (%p1048_p4), 136, %s1036_s12 }
  0x13   : > { %754 = vmatprep.subr.bf16.mxu0 %v1006_v1  ;;  %799 = vmatprep.subr.bf16.mxu1 %v1006_v1  ;;  %s701_s26 = sshll.u32 %s152_s25, 2  ;;  %p424_p8 = scmp.lt.s32.totalorder (%p1048_p4), %s423_s9, 17 }
  0x14   : > { %762 = vmatprep.mubr.msk.bf16.mxu0 %vm1007_vm1, %v1006_v1  ;;  %782 = vmatprep.mubr.msk.bf16.mxu1 %vm1007_vm1, %v1006_v1  ;;  %s1074_s3 = scalar_lea.vmem %s1221_s0, %s701_s26  ;;  %s1131_s18 = scalar_lea.vmem (%p1048_p4), %s1223_s2, %s737_s11  }
  0x15   : > { %v905_v7 = vld [vmem:[%s1074_s3] sm:$0xff]   ;;  %v906_v8 = vld [vmem:[%s1074_s3 + $0x28] sm:$0xff]   ;;  %v908_v10 = vld [vmem:[%s1074_s3 + $0x30] sm:$0xff]  }
  0x16   : > { %755 = vmatpush3.bf16.msra.mxu0 %v901_v3  ;;  %804 = vmatpush3.bf16.msra.mxu1 %v901_v3  ;;  %v907_v9 = vld [vmem:[%s1074_s3 + $0x8] sm:$0xff]   ;;  %v909_v11 = vld [vmem:[%s1074_s3 + $0x10] sm:$0xff]   ;;  %v910_v12 = vld [vmem:[%s1074_s3 + $0x38] sm:$0xff]  }
  0x17   : > { %756 = vmatprep.subr.bf16.mxu0 %v1006_v1  ;;  %800 = vmatprep.subr.bf16.mxu1 %v1006_v1  ;;  %v911_v13 = vld [vmem:[%s1074_s3 + $0x18] sm:$0xff]   ;;  %v912_v14 = vld [vmem:[%s1074_s3 + $0x40] ss:$0 sps:$4 sm:$0xff]  }
  0x18   : > { %v913_v15 = vld [vmem:[%s1074_s3 + $0x20] sm:$0xff]  }
  0x1a   : > { %757 = vmatpush3.bf16.msra.mxu0 %v902_v4  ;;  %805 = vmatpush3.bf16.msra.mxu1 %v902_v4 }
  0x1b   : > { %758 = vmatprep.subr.bf16.mxu0 %v1006_v1  ;;  %801 = vmatprep.subr.bf16.mxu1 %v1006_v1 }
  0x1e   : > { %759 = vmatpush3.bf16.msra.mxu0 %v903_v5  ;;  %806 = vmatpush3.bf16.msra.mxu1 %v903_v5 }
  0x1f   : > { %760 = vmatprep.subr.bf16.mxu0 %v1006_v1  ;;  %802 = vmatprep.subr.bf16.mxu1 %v1006_v1 }
  0x22   : > { %761 = vmatpush3.bf16.msra.mxu0 %v904_v6  ;;  %807 = vmatpush3.bf16.msra.mxu1 %v904_v6 }
  0x25   : > { %763 = vmatmul.mubr.msk.bf16.vlgmr.msra.gmra.mxu0 %vm262_vm2, %v905_v7  ;;  %783 = vmatmul.mubr.msk.bf16.vlgmr.msra.gmra.mxu1 %vm262_vm2, %v906_v8 }
  0x26   : > { %766 = vmatprep.mubr.msk.bf16.mxu0 %vm1007_vm1, %v1006_v1  ;;  %786 = vmatprep.mubr.msk.bf16.mxu1 %vm1007_vm1, %v1006_v1 }
  0x2d   : > { %767 = vmatmul.mubr.msk.bf16.gmra.mxu0 %vm262_vm2, %v907_v9  ;;  %787 = vmatmul.mubr.msk.bf16.gmra.mxu1 %vm262_vm2, %v908_v10 }
  0x2e   : > { %770 = vmatprep.mubr.msk.bf16.mxu0 %vm1007_vm1, %v1006_v1  ;;  %790 = vmatprep.mubr.msk.bf16.mxu1 %vm1007_vm1, %v1006_v1 }
  0x35   : > { %771 = vmatmul.mubr.msk.bf16.gmra.mxu0 %vm262_vm2, %v909_v11  ;;  %791 = vmatmul.mubr.msk.bf16.gmra.mxu1 %vm262_vm2, %v910_v12 }
  0x36   : > { %774 = vmatprep.mubr.msk.bf16.mxu0 %vm1007_vm1, %v1006_v1  ;;  %794 = vmatprep.mubr.msk.bf16.mxu1 %vm1007_vm1, %v1006_v1 }
  0x3d   : > { %775 = vmatmul.mubr.msk.bf16.gmra.mxu0 %vm262_vm2, %v911_v13  ;;  %795 = vmatmul.mubr.msk.bf16.gmra.mxu1 %vm262_vm2, %v912_v14 }
  0x3e   : > { %778 = vmatprep.mubr.msk.bf16.mxu0 %vm1007_vm1, %v1006_v1 }
  0x45   : > { %779 = vmatmul.mubr.msk.bf16.gmra.mxu0 %vm262_vm2, %v913_v15 }
  0xe5   : > { %v328_v16 = vpop.f32.mrf.mxu0  ;;  %v368_v17 = vpop.f32.mrf.mxu1 }
  0xe6   : > { %398 = vst [vmem:[%s1105_s8] sm:$0xff] %v328_v16  ;;  %408 = vst [vmem:[%s1105_s8 + $0x50] sm:$0xff] %v368_v17 }
  0xe7   : > { %v764_v18 = vpop.f32.mrf.mxu0  ;;  %v784_v19 = vpop.f32.mrf.mxu1 }
  0xe9   : > { %v331_v20 = vpop.f32.mrf.mxu0  ;;  %v371_v21 = vpop.f32.mrf.mxu1 }
  0xea   : > { %399 = vst [vmem:[%s1105_s8 + $0x8] sm:$0xff] %v331_v20  ;;  %409 = vst [vmem:[%s1105_s8 + $0x58] sm:$0xff] %v371_v21 }
  0xeb   : > { %v765_v22 = vpop.f32.mrf.mxu0  ;;  %v785_v23 = vpop.f32.mrf.mxu1 }
  0xed   : > { %v336_v24 = vpop.f32.mrf.mxu0  ;;  %v376_v25 = vpop.f32.mrf.mxu1 }
  0xee   : > { %400 = vst [vmem:[%s1105_s8 + $0x10] sm:$0xff] %v336_v24  ;;  %410 = vst [vmem:[%s1105_s8 + $0x60] sm:$0xff] %v376_v25 }
  0xef   : > { %v768_v26 = vpop.f32.mrf.mxu0  ;;  %v788_v27 = vpop.f32.mrf.mxu1 }
  0xf1   : > { %v339_v28 = vpop.f32.mrf.mxu0  ;;  %v379_v29 = vpop.f32.mrf.mxu1 }
  0xf2   : > { %401 = vst [vmem:[%s1105_s8 + $0x18] sm:$0xff] %v339_v28  ;;  %411 = vst [vmem:[%s1105_s8 + $0x68] sm:$0xff] %v379_v29 }
  0xf3   : > { %v769_v30 = vpop.f32.mrf.mxu0  ;;  %v789_v31 = vpop.f32.mrf.mxu1 }
  0xf5   : > { %v344_v32 = vpop.f32.mrf.mxu0  ;;  %v384_v33 = vpop.f32.mrf.mxu1 }
  0xf6   : > { %402 = vst [vmem:[%s1105_s8 + $0x20] sm:$0xff] %v344_v32  ;;  %412 = vst [vmem:[%s1105_s8 + $0x70] sm:$0xff] %v384_v33 }
  0xf7   : > { %v772_v34 = vpop.f32.mrf.mxu0  ;;  %v792_v35 = vpop.f32.mrf.mxu1 }
  0xf9   : > { %v347_v36 = vpop.f32.mrf.mxu0  ;;  %v387_v37 = vpop.f32.mrf.mxu1 }
  0xfa   : > { %403 = vst [vmem:[%s1105_s8 + $0x28] sm:$0xff] %v347_v36  ;;  %413 = vst [vmem:[%s1105_s8 + $0x78] sm:$0xff] %v387_v37 }
  0xfb   : > { %v773_v38 = vpop.f32.mrf.mxu0  ;;  %v793_v39 = vpop.f32.mrf.mxu1 }
  0xfd   : > { %v352_v40 = vpop.f32.mrf.mxu0  ;;  %v392_v41 = vpop.f32.mrf.mxu1 }
  0xfe   : > { %404 = vst [vmem:[%s1105_s8 + $0x30] sm:$0xff] %v352_v40  ;;  %414 = vst [vmem:[%s1105_s8 + $0x80] sm:$0xff] %v392_v41 }
  0xff   : > { %v776_v42 = vpop.f32.mrf.mxu0  ;;  %v796_v43 = vpop.f32.mrf.mxu1 }
 0x101   : > { %v355_v44 = vpop.f32.mrf.mxu0  ;;  %v395_v45 = vpop.f32.mrf.mxu1 }
 0x102   : > { %405 = vst [vmem:[%s1105_s8 + $0x38] sm:$0xff] %v355_v44 }
 0x103   : > { %v777_v46 = vpop.f32.mrf.mxu0  ;;  %v797_v47 = vpop.f32.mrf.mxu1 }
 0x105   : > { %v360_v48 = vpop.f32.mrf.mxu0 }
 0x106   : > { %406 = vst [vmem:[%s1105_s8 + $0x40] sm:$0xff] %v360_v48 }
 0x107   : > { %v780_v49 = vpop.f32.mrf.mxu0  ;;  %421 = sbr.rel (!%p1048_p4) target bundleno = 323 (0x143), region = 32 }
 0x109   : > { %v363_v50 = vpop.f32.mrf.mxu0 }
 0x10a   : > { %407 = vst [vmem:[%s1105_s8 + $0x48] sm:$0xff] %v363_v50 }
 0x10b   : > { %v781_v51 = vpop.f32.mrf.mxu0 }
 0x10c   : > { %s1232_s9 = smov (!%p424_p8, %s423_s9), 17 }
 0x10d   : > { %s725_s19 = sshll.u32 %s1232_s9, 7 }
 0x10e   : > { %p728_p9 = scmp.eq.s32.totalorder %s725_s19, 0 }
 0x10f   : > { %914 = sdivrem.u32 (!%p728_p9), %s1232_s9, 17 }
 0x110   : > { %432 = sbr.rel (%p728_p9) target bundleno = 323 (0x143), region = 36 }
 0x118   : > { %s1137_s17 = spop.drf %914 }
 0x119   : > { %p729_p10 = scmp.le.s32.totalorder %s1137_s17, 0 }
 0x11a   : > { %s1225_s12 = smov (!%p729_p10), %s1131_s18  ;;  %s1226_s20 = smov (!%p729_p10), %s1105_s8 }
 0x11b   : > { %653 = sbr.rel (%p729_p10) target bundleno = 298 (0x12a), region = 112  ;;  %s1146_s21 = smov (!%p729_p10), 0  }
 0x11c   : > { %s1148_s22 = smov (!%p729_p10), 0  }
 0x120 LB: >> { %v529_v52 = vld [vmem:[%s980_s20] sm:$0xff]  ;;  %v531_v53 = vld [vmem:[%s980_s20 + $0x8] sm:$0xff]  ;;  %v533_v54 = vld [vmem:[%s980_s20 + $0x10] sm:$0xff]  ;;  %s563_s23 = sadd.s32 1, %s984_s21  ;;  %s523_s22 = sadd.s32 1, %s988_s22   ;;  %s988_s22 = sphi %s1148_s22, %s523_s22   ;;  %s984_s21 = sphi %s1146_s21, %s1227_s21   ;;  %s980_s20 = sphi %s1226_s20, %s568_s20   ;;  %s976_s12 = sphi %s1225_s12, %s569_s12  }
 0x121   : >> { %530 = vst [vmem:[%s976_s12] sm:$0xff] %v529_v52  ;;  %532 = vst [vmem:[%s976_s12 + $0x8] sm:$0xff] %v531_v53  ;;  %v535_v55 = vld [vmem:[%s980_s20 + $0x18] sm:$0xff]  ;;  %v537_v56 = vld [vmem:[%s980_s20 + $0x20] sm:$0xff]  ;;  %p564_p11 = scmp.ge.s32.totalorder %s563_s23, %s1137_s17  ;;  %p522_p12 = scmp.ge.s32.totalorder %s523_s22, %s1137_s17 }
 0x122   : >> { %534 = vst [vmem:[%s976_s12 + $0x10] sm:$0xff] %v533_v54  ;;  %v539_v57 = vld [vmem:[%s980_s20 + $0x28] sm:$0xff]  ;;  %536 = vst [vmem:[%s976_s12 + $0x18] sm:$0xff] %v535_v55  ;;  %v541_v58 = vld [vmem:[%s980_s20 + $0x30] sm:$0xff] }
 0x123   : >> { %538 = vst [vmem:[%s976_s12 + $0x20] sm:$0xff] %v537_v56  ;;  %540 = vst [vmem:[%s976_s12 + $0x28] sm:$0xff] %v539_v57  ;;  %v543_v59 = vld [vmem:[%s980_s20 + $0x38] sm:$0xff]  ;;  %v545_v60 = vld [vmem:[%s980_s20 + $0x40] sm:$0xff]  ;;  %s1234_s23 = smov (%p564_p11, %s563_s23), 0 }
 0x124   : >> { %542 = vst [vmem:[%s976_s12 + $0x30] sm:$0xff] %v541_v58  ;;  %544 = vst [vmem:[%s976_s12 + $0x38] sm:$0xff] %v543_v59  ;;  %v547_v61 = vld [vmem:[%s980_s20 + $0x48] sm:$0xff]  ;;  %v549_v62 = vld [vmem:[%s980_s20 + $0x50] sm:$0xff]  ;;  %s566_s24 = smul.u32 136, %s1234_s23  ;;  %s1227_s21 = smov %s1234_s23 }
 0x125   : >> { %546 = vst [vmem:[%s976_s12 + $0x40] sm:$0xff] %v545_v60  ;;  %v551_v63 = vld [vmem:[%s980_s20 + $0x58] sm:$0xff]  ;;  %548 = vst [vmem:[%s976_s12 + $0x48] sm:$0xff] %v547_v61  ;;  %v553_v0 = vld [vmem:[%s980_s20 + $0x60] sm:$0xff]  ;;  %525 = sbr.rel (!%p522_p12) target bundleno = 288 (0x120), region = 118 }
 0x126   : >> { %550 = vst [vmem:[%s976_s12 + $0x50] sm:$0xff] %v549_v62  ;;  %552 = vst [vmem:[%s976_s12 + $0x58] sm:$0xff] %v551_v63  ;;  %v555_v1 = vld [vmem:[%s980_s20 + $0x68] sm:$0xff]  ;;  %v557_v2 = vld [vmem:[%s980_s20 + $0x70] sm:$0xff] }
 0x127   : >> { %554 = vst [vmem:[%s976_s12 + $0x60] sm:$0xff] %v553_v0  ;;  %556 = vst [vmem:[%s976_s12 + $0x68] sm:$0xff] %v555_v1  ;;  %v559_v3 = vld [vmem:[%s980_s20 + $0x78] sm:$0xff]  ;;  %v561_v4 = vld [vmem:[%s980_s20 + $0x80] sm:$0xff]  ;;  %s568_s20 = scalar_lea.vmem %s1105_s8, %s566_s24 [#allocation2]  }
 0x128   : >> { %558 = vst [vmem:[%s976_s12 + $0x70] sm:$0xff] %v557_v2  ;;  %560 = vst [vmem:[%s976_s12 + $0x78] sm:$0xff] %v559_v3 }
 0x129   : >> { %562 = vst [vmem:[%s976_s12 + $0x80] sm:$0xff] %v561_v4  ;;  %s569_s12 = scalar_lea.vmem %s1131_s18, %s566_s24  }
 0x12a PF: > { %916 = sdivrem.u32 %s1232_s9, 17 }
 0x12b   : > { %s730_s25 = smul.u32 136, %s1137_s17 }
 0x12d   : > { %s574_s26 = scalar_lea.vmem %s1105_s8, %s730_s25 [#allocation2]   ;;  %s576_s27 = scalar_lea.vmem %s1131_s18, %s730_s25  }
 0x133   : > { %s917_s28 = spop.drf %916 }
 0x134   : > { %p732_p13 = scmp.le.s32.totalorder %s917_s28, 0 }
 0x135   : > { %s990_s29 = smov (!%p732_p13), %s576_s27   ;;  %s994_s30 = smov (!%p732_p13), %s574_s26  }
 0x136   : > { %667 = sbr.rel (%p732_p13) target bundleno = 323 (0x143), region = 123  ;;  %s998_s3 = smov (!%p732_p13), 0  }
 0x137   : > { %s1002_s4 = smov (!%p732_p13), 0  }
 0x13b LB: >> { %v586_v5 = vld [vmem:[%s996_s30] sm:$0xff]  ;;  %s588_s5 = sadd.s32 1, %s1000_s3  ;;  %s580_s4 = sadd.s32 1, %s1004_s4   ;;  %s1004_s4 = sphi %s1002_s4, %s580_s4   ;;  %s1000_s3 = sphi %s998_s3, %s999_s3   ;;  %s996_s30 = sphi %s994_s30, %s593_s30   ;;  %s992_s29 = sphi %s990_s29, %s594_s29  }
 0x13c   : >> { %587 = vst [vmem:[%s992_s29] sm:$0xff] %v586_v5  ;;  %p589_p0 = scmp.ge.s32.totalorder %s588_s5, %s917_s28  ;;  %p579_p1 = scmp.ge.s32.totalorder %s580_s4, %s917_s28 }
 0x13e   : >> { %s1236_s5 = smov (%p589_p0, %s588_s5), 0  ;;  %582 = sbr.rel (!%p579_p1) target bundleno = 315 (0x13b), region = 129 }
 0x13f   : >> { %s733_s6 = sshll.u32 %s1236_s5, 3  ;;  %s999_s3 = smov %s1236_s5  }
 0x140   : >> { %s593_s30 = scalar_lea.vmem %s574_s26, %s733_s6 [#allocation2]   ;;  %s594_s29 = scalar_lea.vmem %s576_s27, %s733_s6  }
 0x143 PF: > { %p9_p2 = scmp.ge.s32.totalorder %s1038_s13, 4   ;;  %s1228_s9 = smov %s968_s10 }
 0x144   : > { %s1229_s10 = smov %s1046_s16  ;;  %s1230_s11 = smov %s1038_s13 }
 0x145   :  { %11 = sbr.rel (!%p9_p2) target bundleno = 2 (0x2), region = 140 }

// kernel: _lambda_.7
= control target key start
LH: loop header
LB: loop body
LE: loop exit
PB: predicated region body
PF: predicated region fallthrough
CT: control target
= control target key end

     0   :  { %s1753_s9 = smov 0   ;;  %s1755_s10 = smov 0   ;;  %s2135_s0 = inlined_call_operand.vmem [shape: bf16[2050,28], index: 0, kind: input, shape index: {}]   ;;  %s2136_s1 = inlined_call_operand.vmem [shape: bf16[28,128], index: 1, kind: input, shape index: {}]   ;;  %s2137_s2 = inlined_call_operand.vmem [shape: f32[2050,128], index: 2, kind: output, shape index: {}]  }
   0x1   :  { %s1757_s11 = smov 0  }
   0x2 LB: > { %s1766_s12 = sadd.s32 4294967295, %s1704_s11   ;;  %s1768_s13 = sadd.s32 1, %s1704_s11   ;;  %s1704_s11 = sphi %s1757_s11, %s2146_s11   ;;  %s1700_s10 = sphi %s1755_s10, %s2145_s10   ;;  %s1696_s9 = sphi %s1753_s9, %s2144_s9  }
   0x3   : > { %s63_s14 = ssub.s32 %s1704_s11, %s1768_s13  ;;  %s66_s15 = sadd.s32 1, %s1700_s10 }
   0x4   : > { %p64_p0 = scmp.eq.s32.totalorder %s63_s14, 0  ;;  %p76_p1 = scmp.ne.s32.totalorder %s1700_s10, %s1696_s9 }
   0x5   : > { %p77_p2 = scmp.eq.s32.totalorder %s1766_s12, 4  ;;  %p1330_p3 = scmp.ge.s32.totalorder %s1704_s11, 1 }
   0x6   : > { %s1776_s16 = scalar_select %p64_p0, %s1700_s10, %s66_s15  }
   0x7   : > { %p1778_p4 = por %p77_p2, %p76_p1  ;;  %p121_p5 = scmp.lt.s32.totalorder %s1704_s11, 6 }
   0x9   : > { %p122_p6 = pnand %p1330_p3, %p121_p5 }
   0xa   : > { %s1789_s22 = sshll.u32 (!%p122_p6), %s1766_s12, 6  ;;  %s143_s28 = sand.u32 (!%p122_p6), 1, %s1696_s9  }
   0xb   : > { %125 = sbr.rel (%p122_p6) target bundleno = 345 (0x159), region = 28  ;;  %p151_p7 = scmp.lt.s32.totalorder (!%p122_p6), %s1789_s22, 256 }
   0xc   : > { %s1331_s29 = sshll.u32 (!%p122_p6), %s143_s28, 9 }
   0xd   : > { %s1863_s30 = scalar_lea.vmem (!%p122_p6), [#allocation2], %s1331_s29  }
  0x10   : > { %v1616_v0 = vld [vmem:[%s2136_s1 + $0x8] sm:$0x3f]   ;;  %vm502_vm0 = vcmask 1045504   ;;  %v1617_v1 = vld [vmem:[%s2136_s1] sm:$0xff]   ;;  %s152_s23 = scalar_select %p151_p7, %s1789_s22, 256  ;;  %vm405_vm1 = vcmask 228352  }
  0x11   : > { %1526 = vmatprep.subr.msk.bf16.mxu0 %vm502_vm0, %v1616_v0  ;;  %1527 = vmatprep.subr.msk.bf16.mxu1 %vm502_vm0, %v1616_v0  ;;  %v504_v2 = vsel %vm502_vm0, %v1616_v0, 0  ;;  %s867_s3 = ssub.s32 (%p1778_p4), 257, %s1789_s22  ;;  %s1417_s4 = sshll.u32 (%p1778_p4), %s1766_s12, 9 }
  0x12   : > { %1455 = vmatpush3.bf16.msra.mxu0 %v504_v2  ;;  %1524 = vmatpush3.bf16.msra.mxu1 %v504_v2  ;;  %s1333_s24 = sshll.u32 %s152_s23, 2  ;;  %p868_p8 = scmp.lt.s32.totalorder (%p1778_p4), %s867_s3, 64 }
  0x13   : > { %1456 = vmatprep.subr.bf16.mxu0 %v1617_v1  ;;  %1523 = vmatprep.subr.bf16.mxu1 %v1617_v1  ;;  %s1796_s27 = scalar_lea.vmem %s2135_s0, %s1333_s24  ;;  %s1936_s7 = scalar_lea.vmem (%p1778_p4), %s2137_s2, %s1417_s4  }
  0x14   : > { %v1618_v3 = vld [vmem:[%s1796_s27] sm:$0xff]   ;;  %v1620_v5 = vld [vmem:[%s1796_s27 + $0x8] sm:$0xff]   ;;  %v1622_v7 = vld [vmem:[%s1796_s27 + $0x10] sm:$0xff]  }
  0x15   : > { %v1619_v4 = vld [vmem:[%s1796_s27 + $0x80] sm:$0xff]   ;;  %1458 = vmatprep.mubr.msk.bf16.mxu0 %vm405_vm1, %v1618_v3  ;;  %v1621_v6 = vld [vmem:[%s1796_s27 + $0x88] sm:$0xff]   ;;  %v1623_v8 = vld [vmem:[%s1796_s27 + $0x90] sm:$0xff]  }
  0x16   : > { %1457 = vmatpush3.bf16.msra.mxu0 %v1617_v1  ;;  %1525 = vmatpush3.bf16.msra.mxu1 %v1617_v1  ;;  %v1624_v9 = vld [vmem:[%s1796_s27 + $0x18] sm:$0xff]   ;;  %v1626_v11 = vld [vmem:[%s1796_s27 + $0x20] sm:$0xff]   ;;  %v1628_v13 = vld [vmem:[%s1796_s27 + $0x28] sm:$0xff]  }
  0x17   : > { %1490 = vmatprep.mubr.msk.bf16.mxu1 %vm405_vm1, %v1619_v4  ;;  %v1625_v10 = vld [vmem:[%s1796_s27 + $0x98] sm:$0xff]   ;;  %v1627_v12 = vld [vmem:[%s1796_s27 + $0xa0] sm:$0xff]   ;;  %v1629_v14 = vld [vmem:[%s1796_s27 + $0xa8] sm:$0xff]  }
  0x18   : > { %v1630_v15 = vld [vmem:[%s1796_s27 + $0x30] sm:$0xff]   ;;  %v1632_v17 = vld [vmem:[%s1796_s27 + $0x38] sm:$0xff]   ;;  %v1634_v19 = vld [vmem:[%s1796_s27 + $0x40] sm:$0xff]  }
  0x19   : > { %1459 = vmatmul.mubr.msk.bf16.vlgmr.msra.gmra.mxu0 %vm405_vm1, %v1620_v5  ;;  %1491 = vmatmul.mubr.msk.bf16.vlgmr.msra.gmra.mxu1 %vm405_vm1, %v1621_v6  ;;  %v1631_v16 = vld [vmem:[%s1796_s27 + $0xb0] sm:$0xff]   ;;  %v1633_v18 = vld [vmem:[%s1796_s27 + $0xb8] sm:$0xff]   ;;  %v1635_v20 = vld [vmem:[%s1796_s27 + $0xc0] sm:$0xff]  }
  0x1a   : > { %1462 = vmatprep.mubr.msk.bf16.mxu0 %vm405_vm1, %v1622_v7  ;;  %1494 = vmatprep.mubr.msk.bf16.mxu1 %vm405_vm1, %v1623_v8  ;;  %v1636_v21 = vld [vmem:[%s1796_s27 + $0x48] sm:$0xff]   ;;  %v1638_v23 = vld [vmem:[%s1796_s27 + $0x50] sm:$0xff]   ;;  %v1640_v25 = vld [vmem:[%s1796_s27 + $0x58] sm:$0xff]  }
  0x1b   : > { %v1637_v22 = vld [vmem:[%s1796_s27 + $0xc8] sm:$0xff]   ;;  %v1639_v24 = vld [vmem:[%s1796_s27 + $0xd0] sm:$0xff]   ;;  %v1641_v26 = vld [vmem:[%s1796_s27 + $0xd8] sm:$0xff]  }
  0x1c   : > { %v1642_v27 = vld [vmem:[%s1796_s27 + $0x60] sm:$0xff]   ;;  %v1644_v29 = vld [vmem:[%s1796_s27 + $0x68] sm:$0xff]   ;;  %v1646_v31 = vld [vmem:[%s1796_s27 + $0x70] sm:$0xff]  }
  0x1d   : > { %v1643_v28 = vld [vmem:[%s1796_s27 + $0xe0] sm:$0xff]   ;;  %v1645_v30 = vld [vmem:[%s1796_s27 + $0xe8] sm:$0xff]   ;;  %v1647_v32 = vld [vmem:[%s1796_s27 + $0xf0] sm:$0xff]  }
  0x1e   : > { %v1648_v33 = vld [vmem:[%s1796_s27 + $0x78] sm:$0xff]  }
  0x1f   : > { %v1649_v34 = vld [vmem:[%s1796_s27 + $0xf8] sm:$0xff]  }
  0x21   : > { %1463 = vmatmul.mubr.msk.bf16.gmra.mxu0 %vm405_vm1, %v1624_v9  ;;  %1495 = vmatmul.mubr.msk.bf16.gmra.mxu1 %vm405_vm1, %v1625_v10 }
  0x22   : > { %1466 = vmatprep.mubr.msk.bf16.mxu0 %vm405_vm1, %v1626_v11  ;;  %1498 = vmatprep.mubr.msk.bf16.mxu1 %vm405_vm1, %v1627_v12 }
  0x29   : > { %1467 = vmatmul.mubr.msk.bf16.gmra.mxu0 %vm405_vm1, %v1628_v13  ;;  %1499 = vmatmul.mubr.msk.bf16.gmra.mxu1 %vm405_vm1, %v1629_v14 }
  0x2a   : > { %1470 = vmatprep.mubr.msk.bf16.mxu0 %vm405_vm1, %v1630_v15  ;;  %1502 = vmatprep.mubr.msk.bf16.mxu1 %vm405_vm1, %v1631_v16 }
  0x31   : > { %1471 = vmatmul.mubr.msk.bf16.gmra.mxu0 %vm405_vm1, %v1632_v17  ;;  %1503 = vmatmul.mubr.msk.bf16.gmra.mxu1 %vm405_vm1, %v1633_v18 }
  0x32   : > { %1474 = vmatprep.mubr.msk.bf16.mxu0 %vm405_vm1, %v1634_v19  ;;  %1506 = vmatprep.mubr.msk.bf16.mxu1 %vm405_vm1, %v1635_v20 }
  0x39   : > { %1475 = vmatmul.mubr.msk.bf16.gmra.mxu0 %vm405_vm1, %v1636_v21  ;;  %1507 = vmatmul.mubr.msk.bf16.gmra.mxu1 %vm405_vm1, %v1637_v22 }
  0x3a   : > { %1478 = vmatprep.mubr.msk.bf16.mxu0 %vm405_vm1, %v1638_v23  ;;  %1510 = vmatprep.mubr.msk.bf16.mxu1 %vm405_vm1, %v1639_v24 }
  0x41   : > { %1479 = vmatmul.mubr.msk.bf16.gmra.mxu0 %vm405_vm1, %v1640_v25  ;;  %1511 = vmatmul.mubr.msk.bf16.gmra.mxu1 %vm405_vm1, %v1641_v26 }
  0x42   : > { %1482 = vmatprep.mubr.msk.bf16.mxu0 %vm405_vm1, %v1642_v27  ;;  %1514 = vmatprep.mubr.msk.bf16.mxu1 %vm405_vm1, %v1643_v28 }
  0x49   : > { %1483 = vmatmul.mubr.msk.bf16.gmra.mxu0 %vm405_vm1, %v1644_v29  ;;  %1515 = vmatmul.mubr.msk.bf16.gmra.mxu1 %vm405_vm1, %v1645_v30 }
  0x4a   : > { %1486 = vmatprep.mubr.msk.bf16.mxu0 %vm405_vm1, %v1646_v31  ;;  %1518 = vmatprep.mubr.msk.bf16.mxu1 %vm405_vm1, %v1647_v32 }
  0x51   : > { %1487 = vmatmul.mubr.msk.bf16.gmra.mxu0 %vm405_vm1, %v1648_v33  ;;  %1519 = vmatmul.mubr.msk.bf16.gmra.mxu1 %vm405_vm1, %v1649_v34 }
  0xd9   : > { %v1460_v35 = vpop.f32.mrf.mxu0  ;;  %v1492_v36 = vpop.f32.mrf.mxu1 }
  0xda   : > { %797 = vst [vmem:[%s1863_s30 + $0x10] sm:$0xff] %v1460_v35  ;;  %829 = vst [vmem:[%s1863_s30 + $0x110] sm:$0xff] %v1492_v36 }
  0xdb   : > { %v540_v37 = vpop.f32.mrf.mxu0  ;;  %v668_v38 = vpop.f32.mrf.mxu1 }
  0xdc   : > { %795 = vst [vmem:[%s1863_s30] sm:$0xff] %v540_v37  ;;  %827 = vst [vmem:[%s1863_s30 + $0x100] sm:$0xff] %v668_v38 }
  0xdd   : > { %v1461_v39 = vpop.f32.mrf.mxu0  ;;  %v1493_v40 = vpop.f32.mrf.mxu1 }
  0xde   : > { %798 = vst [vmem:[%s1863_s30 + $0x18] sm:$0xff] %v1461_v39  ;;  %830 = vst [vmem:[%s1863_s30 + $0x118] sm:$0xff] %v1493_v40 }
  0xdf   : > { %v543_v41 = vpop.f32.mrf.mxu0  ;;  %v671_v42 = vpop.f32.mrf.mxu1 }
  0xe0   : > { %796 = vst [vmem:[%s1863_s30 + $0x8] sm:$0xff] %v543_v41  ;;  %828 = vst [vmem:[%s1863_s30 + $0x108] sm:$0xff] %v671_v42 }
  0xe1   : > { %v1464_v43 = vpop.f32.mrf.mxu0  ;;  %v1496_v44 = vpop.f32.mrf.mxu1 }
  0xe2   : > { %801 = vst [vmem:[%s1863_s30 + $0x30] sm:$0xff] %v1464_v43  ;;  %833 = vst [vmem:[%s1863_s30 + $0x130] sm:$0xff] %v1496_v44 }
  0xe3   : > { %v556_v45 = vpop.f32.mrf.mxu0  ;;  %v684_v46 = vpop.f32.mrf.mxu1 }
  0xe4   : > { %799 = vst [vmem:[%s1863_s30 + $0x20] sm:$0xff] %v556_v45  ;;  %831 = vst [vmem:[%s1863_s30 + $0x120] sm:$0xff] %v684_v46 }
  0xe5   : > { %v1465_v47 = vpop.f32.mrf.mxu0  ;;  %v1497_v48 = vpop.f32.mrf.mxu1 }
  0xe6   : > { %802 = vst [vmem:[%s1863_s30 + $0x38] sm:$0xff] %v1465_v47  ;;  %834 = vst [vmem:[%s1863_s30 + $0x138] sm:$0xff] %v1497_v48 }
  0xe7   : > { %v559_v49 = vpop.f32.mrf.mxu0  ;;  %v687_v50 = vpop.f32.mrf.mxu1 }
  0xe8   : > { %800 = vst [vmem:[%s1863_s30 + $0x28] sm:$0xff] %v559_v49  ;;  %832 = vst [vmem:[%s1863_s30 + $0x128] sm:$0xff] %v687_v50 }
  0xe9   : > { %v1468_v51 = vpop.f32.mrf.mxu0  ;;  %v1500_v52 = vpop.f32.mrf.mxu1 }
  0xea   : > { %805 = vst [vmem:[%s1863_s30 + $0x50] sm:$0xff] %v1468_v51  ;;  %837 = vst [vmem:[%s1863_s30 + $0x150] sm:$0xff] %v1500_v52 }
  0xeb   : > { %v572_v53 = vpop.f32.mrf.mxu0  ;;  %v700_v54 = vpop.f32.mrf.mxu1 }
  0xec   : > { %803 = vst [vmem:[%s1863_s30 + $0x40] sm:$0xff] %v572_v53  ;;  %835 = vst [vmem:[%s1863_s30 + $0x140] sm:$0xff] %v700_v54 }
  0xed   : > { %v1469_v55 = vpop.f32.mrf.mxu0  ;;  %v1501_v56 = vpop.f32.mrf.mxu1 }
  0xee   : > { %806 = vst [vmem:[%s1863_s30 + $0x58] sm:$0xff] %v1469_v55  ;;  %838 = vst [vmem:[%s1863_s30 + $0x158] sm:$0xff] %v1501_v56 }
  0xef   : > { %v575_v57 = vpop.f32.mrf.mxu0  ;;  %v703_v58 = vpop.f32.mrf.mxu1 }
  0xf0   : > { %804 = vst [vmem:[%s1863_s30 + $0x48] sm:$0xff] %v575_v57  ;;  %836 = vst [vmem:[%s1863_s30 + $0x148] sm:$0xff] %v703_v58 }
  0xf1   : > { %v1472_v59 = vpop.f32.mrf.mxu0  ;;  %v1504_v60 = vpop.f32.mrf.mxu1 }
  0xf2   : > { %809 = vst [vmem:[%s1863_s30 + $0x70] sm:$0xff] %v1472_v59  ;;  %841 = vst [vmem:[%s1863_s30 + $0x170] sm:$0xff] %v1504_v60 }
  0xf3   : > { %v588_v61 = vpop.f32.mrf.mxu0  ;;  %v716_v62 = vpop.f32.mrf.mxu1 }
  0xf4   : > { %807 = vst [vmem:[%s1863_s30 + $0x60] sm:$0xff] %v588_v61  ;;  %839 = vst [vmem:[%s1863_s30 + $0x160] sm:$0xff] %v716_v62 }
  0xf5   : > { %v1473_v63 = vpop.f32.mrf.mxu0  ;;  %v1505_v0 = vpop.f32.mrf.mxu1 }
  0xf6   : > { %810 = vst [vmem:[%s1863_s30 + $0x78] sm:$0xff] %v1473_v63  ;;  %842 = vst [vmem:[%s1863_s30 + $0x178] sm:$0xff] %v1505_v0 }
  0xf7   : > { %v591_v1 = vpop.f32.mrf.mxu0  ;;  %v719_v2 = vpop.f32.mrf.mxu1 }
  0xf8   : > { %808 = vst [vmem:[%s1863_s30 + $0x68] sm:$0xff] %v591_v1  ;;  %840 = vst [vmem:[%s1863_s30 + $0x168] sm:$0xff] %v719_v2 }
  0xf9   : > { %v1476_v3 = vpop.f32.mrf.mxu0  ;;  %v1508_v4 = vpop.f32.mrf.mxu1 }
  0xfa   : > { %813 = vst [vmem:[%s1863_s30 + $0x90] sm:$0xff] %v1476_v3  ;;  %845 = vst [vmem:[%s1863_s30 + $0x190] sm:$0xff] %v1508_v4 }
  0xfb   : > { %v604_v5 = vpop.f32.mrf.mxu0  ;;  %v732_v6 = vpop.f32.mrf.mxu1 }
  0xfc   : > { %811 = vst [vmem:[%s1863_s30 + $0x80] sm:$0xff] %v604_v5  ;;  %843 = vst [vmem:[%s1863_s30 + $0x180] sm:$0xff] %v732_v6 }
  0xfd   : > { %v1477_v7 = vpop.f32.mrf.mxu0  ;;  %v1509_v8 = vpop.f32.mrf.mxu1 }
  0xfe   : > { %814 = vst [vmem:[%s1863_s30 + $0x98] sm:$0xff] %v1477_v7  ;;  %846 = vst [vmem:[%s1863_s30 + $0x198] sm:$0xff] %v1509_v8 }
  0xff   : > { %v607_v9 = vpop.f32.mrf.mxu0  ;;  %v735_v10 = vpop.f32.mrf.mxu1 }
 0x100   : > { %812 = vst [vmem:[%s1863_s30 + $0x88] sm:$0xff] %v607_v9  ;;  %844 = vst [vmem:[%s1863_s30 + $0x188] sm:$0xff] %v735_v10 }
 0x101   : > { %v1480_v11 = vpop.f32.mrf.mxu0  ;;  %v1512_v12 = vpop.f32.mrf.mxu1 }
 0x102   : > { %817 = vst [vmem:[%s1863_s30 + $0xb0] sm:$0xff] %v1480_v11  ;;  %849 = vst [vmem:[%s1863_s30 + $0x1b0] sm:$0xff] %v1512_v12 }
 0x103   : > { %v620_v13 = vpop.f32.mrf.mxu0  ;;  %v748_v14 = vpop.f32.mrf.mxu1 }
 0x104   : > { %815 = vst [vmem:[%s1863_s30 + $0xa0] sm:$0xff] %v620_v13  ;;  %847 = vst [vmem:[%s1863_s30 + $0x1a0] sm:$0xff] %v748_v14 }
 0x105   : > { %v1481_v15 = vpop.f32.mrf.mxu0  ;;  %v1513_v16 = vpop.f32.mrf.mxu1 }
 0x106   : > { %818 = vst [vmem:[%s1863_s30 + $0xb8] sm:$0xff] %v1481_v15  ;;  %850 = vst [vmem:[%s1863_s30 + $0x1b8] sm:$0xff] %v1513_v16 }
 0x107   : > { %v623_v17 = vpop.f32.mrf.mxu0  ;;  %v751_v18 = vpop.f32.mrf.mxu1 }
 0x108   : > { %816 = vst [vmem:[%s1863_s30 + $0xa8] sm:$0xff] %v623_v17  ;;  %848 = vst [vmem:[%s1863_s30 + $0x1a8] sm:$0xff] %v751_v18 }
 0x109   : > { %v1484_v19 = vpop.f32.mrf.mxu0  ;;  %v1516_v20 = vpop.f32.mrf.mxu1 }
 0x10a   : > { %821 = vst [vmem:[%s1863_s30 + $0xd0] sm:$0xff] %v1484_v19  ;;  %853 = vst [vmem:[%s1863_s30 + $0x1d0] sm:$0xff] %v1516_v20 }
 0x10b   : > { %v636_v21 = vpop.f32.mrf.mxu0  ;;  %v764_v22 = vpop.f32.mrf.mxu1 }
 0x10c   : > { %819 = vst [vmem:[%s1863_s30 + $0xc0] sm:$0xff] %v636_v21  ;;  %851 = vst [vmem:[%s1863_s30 + $0x1c0] sm:$0xff] %v764_v22 }
 0x10d   : > { %v1485_v23 = vpop.f32.mrf.mxu0  ;;  %v1517_v24 = vpop.f32.mrf.mxu1 }
 0x10e   : > { %822 = vst [vmem:[%s1863_s30 + $0xd8] sm:$0xff] %v1485_v23  ;;  %854 = vst [vmem:[%s1863_s30 + $0x1d8] sm:$0xff] %v1517_v24 }
 0x10f   : > { %v639_v25 = vpop.f32.mrf.mxu0  ;;  %v767_v26 = vpop.f32.mrf.mxu1 }
 0x110   : > { %820 = vst [vmem:[%s1863_s30 + $0xc8] sm:$0xff] %v639_v25  ;;  %852 = vst [vmem:[%s1863_s30 + $0x1c8] sm:$0xff] %v767_v26 }
 0x111   : > { %v1488_v27 = vpop.f32.mrf.mxu0  ;;  %v1520_v28 = vpop.f32.mrf.mxu1 }
 0x112   : > { %825 = vst [vmem:[%s1863_s30 + $0xf0] sm:$0xff] %v1488_v27  ;;  %857 = vst [vmem:[%s1863_s30 + $0x1f0] sm:$0xff] %v1520_v28 }
 0x113   : > { %v652_v29 = vpop.f32.mrf.mxu0  ;;  %v780_v30 = vpop.f32.mrf.mxu1 }
 0x114   : > { %823 = vst [vmem:[%s1863_s30 + $0xe0] sm:$0xff] %v652_v29  ;;  %855 = vst [vmem:[%s1863_s30 + $0x1e0] sm:$0xff] %v780_v30  ;;  %865 = sbr.rel (!%p1778_p4) target bundleno = 345 (0x159), region = 32 }
 0x115   : > { %v1489_v31 = vpop.f32.mrf.mxu0  ;;  %v1521_v32 = vpop.f32.mrf.mxu1 }
 0x116   : > { %826 = vst [vmem:[%s1863_s30 + $0xf8] sm:$0xff] %v1489_v31  ;;  %858 = vst [vmem:[%s1863_s30 + $0x1f8] sm:$0xff] %v1521_v32 }
 0x117   : > { %v655_v33 = vpop.f32.mrf.mxu0  ;;  %v783_v34 = vpop.f32.mrf.mxu1 }
 0x118   : > { %824 = vst [vmem:[%s1863_s30 + $0xe8] sm:$0xff] %v655_v33  ;;  %856 = vst [vmem:[%s1863_s30 + $0x1e8] sm:$0xff] %v783_v34 }
 0x119   : > { %s2148_s3 = smov (!%p868_p8, %s867_s3), 64 }
 0x11a   : > { %s1402_s8 = sshll.u32 %s2148_s3, 7 }
 0x11b   : > { %p1405_p9 = scmp.eq.s32.totalorder %s1402_s8, 0 }
 0x11c   : > { %s1942_s9 = sshrl.u32 (!%p1405_p9), %s2148_s3, 6 }
 0x11d   : > { %876 = sbr.rel (%p1405_p9) target bundleno = 345 (0x159), region = 36  ;;  %p1406_p10 = scmp.le.s32.totalorder (!%p1405_p9), %s1942_s9, 0 }
 0x122   : > { %1283 = sbr.rel (%p1406_p10) target bundleno = 328 (0x148), region = 112  ;;  %s2139_s11 = smov (!%p1406_p10), %s1936_s7 }
 0x123   : > { %s2140_s12 = smov (!%p1406_p10), %s1863_s30  ;;  %s1951_s14 = smov (!%p1406_p10), 0  }
 0x124   : > { %s1953_s15 = smov (!%p1406_p10), 0  }
 0x127 LB: >> { %v1065_v35 = vld [vmem:[%s1712_s12] sm:$0xff]  ;;  %v1067_v36 = vld [vmem:[%s1712_s12 + $0x8] sm:$0xff]  ;;  %v1069_v37 = vld [vmem:[%s1712_s12 + $0x10] sm:$0xff]  ;;  %s1193_s17 = sadd.s32 1, %s1716_s14  ;;  %s1059_s15 = sadd.s32 1, %s1720_s15   ;;  %s1720_s15 = sphi %s1953_s15, %s1059_s15   ;;  %s1716_s14 = sphi %s1951_s14, %s2143_s14   ;;  %s1712_s12 = sphi %s2140_s12, %s2142_s12   ;;  %s1708_s11 = sphi %s2139_s11, %s2141_s11  }
 0x128   : >> { %1066 = vst [vmem:[%s1708_s11] sm:$0xff] %v1065_v35  ;;  %1068 = vst [vmem:[%s1708_s11 + $0x8] sm:$0xff] %v1067_v36  ;;  %v1071_v38 = vld [vmem:[%s1712_s12 + $0x18] sm:$0xff]  ;;  %v1073_v39 = vld [vmem:[%s1712_s12 + $0x20] sm:$0xff]  ;;  %p1194_p11 = scmp.ge.s32.totalorder %s1193_s17, %s1942_s9  ;;  %p1058_p12 = scmp.ge.s32.totalorder %s1059_s15, %s1942_s9 }
 0x129   : >> { %1070 = vst [vmem:[%s1708_s11 + $0x10] sm:$0xff] %v1069_v37  ;;  %v1075_v40 = vld [vmem:[%s1712_s12 + $0x28] sm:$0xff]  ;;  %1072 = vst [vmem:[%s1708_s11 + $0x18] sm:$0xff] %v1071_v38  ;;  %v1077_v41 = vld [vmem:[%s1712_s12 + $0x30] sm:$0xff] }
 0x12a   : >> { %1074 = vst [vmem:[%s1708_s11 + $0x20] sm:$0xff] %v1073_v39  ;;  %1076 = vst [vmem:[%s1708_s11 + $0x28] sm:$0xff] %v1075_v40  ;;  %v1079_v42 = vld [vmem:[%s1712_s12 + $0x38] sm:$0xff]  ;;  %v1081_v43 = vld [vmem:[%s1712_s12 + $0x40] sm:$0xff]  ;;  %s2150_s17 = smov (%p1194_p11, %s1193_s17), 0 }
 0x12b   : >> { %1078 = vst [vmem:[%s1708_s11 + $0x30] sm:$0xff] %v1077_v41  ;;  %1080 = vst [vmem:[%s1708_s11 + $0x38] sm:$0xff] %v1079_v42  ;;  %v1083_v44 = vld [vmem:[%s1712_s12 + $0x48] sm:$0xff]  ;;  %v1085_v45 = vld [vmem:[%s1712_s12 + $0x50] sm:$0xff]  ;;  %s1407_s18 = sshll.u32 %s2150_s17, 9  ;;  %s2143_s14 = smov %s2150_s17 }
 0x12c   : >> { %1082 = vst [vmem:[%s1708_s11 + $0x40] sm:$0xff] %v1081_v43  ;;  %v1087_v46 = vld [vmem:[%s1712_s12 + $0x58] sm:$0xff]  ;;  %1084 = vst [vmem:[%s1708_s11 + $0x48] sm:$0xff] %v1083_v44  ;;  %v1089_v47 = vld [vmem:[%s1712_s12 + $0x60] sm:$0xff]  ;;  %s2009_s19 = scalar_lea.vmem %s1863_s30, %s1407_s18 [#allocation2]   ;;  %s2012_s20 = scalar_lea.vmem %s1936_s7, %s1407_s18  }
 0x12d   : >> { %1086 = vst [vmem:[%s1708_s11 + $0x50] sm:$0xff] %v1085_v45  ;;  %1088 = vst [vmem:[%s1708_s11 + $0x58] sm:$0xff] %v1087_v46  ;;  %v1091_v48 = vld [vmem:[%s1712_s12 + $0x68] sm:$0xff]  ;;  %v1093_v49 = vld [vmem:[%s1712_s12 + $0x70] sm:$0xff] }
 0x12e   : >> { %1090 = vst [vmem:[%s1708_s11 + $0x60] sm:$0xff] %v1089_v47  ;;  %1092 = vst [vmem:[%s1708_s11 + $0x68] sm:$0xff] %v1091_v48  ;;  %v1095_v50 = vld [vmem:[%s1712_s12 + $0x78] sm:$0xff]  ;;  %v1097_v51 = vld [vmem:[%s1712_s12 + $0x80] sm:$0xff] }
 0x12f   : >> { %1094 = vst [vmem:[%s1708_s11 + $0x70] sm:$0xff] %v1093_v49  ;;  %v1099_v52 = vld [vmem:[%s1712_s12 + $0x88] sm:$0xff]  ;;  %1096 = vst [vmem:[%s1708_s11 + $0x78] sm:$0xff] %v1095_v50  ;;  %v1101_v53 = vld [vmem:[%s1712_s12 + $0x90] sm:$0xff] }
 0x130   : >> { %1098 = vst [vmem:[%s1708_s11 + $0x80] sm:$0xff] %v1097_v51  ;;  %1100 = vst [vmem:[%s1708_s11 + $0x88] sm:$0xff] %v1099_v52  ;;  %v1103_v54 = vld [vmem:[%s1712_s12 + $0x98] sm:$0xff]  ;;  %v1105_v55 = vld [vmem:[%s1712_s12 + $0xa0] sm:$0xff] }
 0x131   : >> { %1102 = vst [vmem:[%s1708_s11 + $0x90] sm:$0xff] %v1101_v53  ;;  %1104 = vst [vmem:[%s1708_s11 + $0x98] sm:$0xff] %v1103_v54  ;;  %v1107_v56 = vld [vmem:[%s1712_s12 + $0xa8] sm:$0xff]  ;;  %v1109_v57 = vld [vmem:[%s1712_s12 + $0xb0] sm:$0xff] }
 0x132   : >> { %1106 = vst [vmem:[%s1708_s11 + $0xa0] sm:$0xff] %v1105_v55  ;;  %v1111_v58 = vld [vmem:[%s1712_s12 + $0xb8] sm:$0xff]  ;;  %1108 = vst [vmem:[%s1708_s11 + $0xa8] sm:$0xff] %v1107_v56  ;;  %v1113_v59 = vld [vmem:[%s1712_s12 + $0xc0] sm:$0xff] }
 0x133   : >> { %1110 = vst [vmem:[%s1708_s11 + $0xb0] sm:$0xff] %v1109_v57  ;;  %1112 = vst [vmem:[%s1708_s11 + $0xb8] sm:$0xff] %v1111_v58  ;;  %v1115_v60 = vld [vmem:[%s1712_s12 + $0xc8] sm:$0xff]  ;;  %v1117_v61 = vld [vmem:[%s1712_s12 + $0xd0] sm:$0xff] }
 0x134   : >> { %1114 = vst [vmem:[%s1708_s11 + $0xc0] sm:$0xff] %v1113_v59  ;;  %1116 = vst [vmem:[%s1708_s11 + $0xc8] sm:$0xff] %v1115_v60  ;;  %v1119_v62 = vld [vmem:[%s1712_s12 + $0xd8] sm:$0xff]  ;;  %v1121_v63 = vld [vmem:[%s1712_s12 + $0xe0] sm:$0xff] }
 0x135   : >> { %1118 = vst [vmem:[%s1708_s11 + $0xd0] sm:$0xff] %v1117_v61  ;;  %v1123_v0 = vld [vmem:[%s1712_s12 + $0xe8] sm:$0xff]  ;;  %1120 = vst [vmem:[%s1708_s11 + $0xd8] sm:$0xff] %v1119_v62  ;;  %v1125_v1 = vld [vmem:[%s1712_s12 + $0xf0] sm:$0xff] }
 0x136   : >> { %1122 = vst [vmem:[%s1708_s11 + $0xe0] sm:$0xff] %v1121_v63  ;;  %1124 = vst [vmem:[%s1708_s11 + $0xe8] sm:$0xff] %v1123_v0  ;;  %v1127_v2 = vld [vmem:[%s1712_s12 + $0xf8] sm:$0xff]  ;;  %v1129_v3 = vld [vmem:[%s1712_s12 + $0x100] sm:$0xff] }
 0x137   : >> { %1126 = vst [vmem:[%s1708_s11 + $0xf0] sm:$0xff] %v1125_v1  ;;  %1128 = vst [vmem:[%s1708_s11 + $0xf8] sm:$0xff] %v1127_v2  ;;  %v1131_v4 = vld [vmem:[%s1712_s12 + $0x108] sm:$0xff]  ;;  %v1133_v5 = vld [vmem:[%s1712_s12 + $0x110] sm:$0xff] }
 0x138   : >> { %1130 = vst [vmem:[%s1708_s11 + $0x100] sm:$0xff] %v1129_v3  ;;  %v1135_v6 = vld [vmem:[%s1712_s12 + $0x118] sm:$0xff]  ;;  %1132 = vst [vmem:[%s1708_s11 + $0x108] sm:$0xff] %v1131_v4  ;;  %v1137_v7 = vld [vmem:[%s1712_s12 + $0x120] sm:$0xff] }
 0x139   : >> { %1134 = vst [vmem:[%s1708_s11 + $0x110] sm:$0xff] %v1133_v5  ;;  %1136 = vst [vmem:[%s1708_s11 + $0x118] sm:$0xff] %v1135_v6  ;;  %v1139_v8 = vld [vmem:[%s1712_s12 + $0x128] sm:$0xff]  ;;  %v1141_v9 = vld [vmem:[%s1712_s12 + $0x130] sm:$0xff] }
 0x13a   : >> { %1138 = vst [vmem:[%s1708_s11 + $0x120] sm:$0xff] %v1137_v7  ;;  %1140 = vst [vmem:[%s1708_s11 + $0x128] sm:$0xff] %v1139_v8  ;;  %v1143_v10 = vld [vmem:[%s1712_s12 + $0x138] sm:$0xff]  ;;  %v1145_v11 = vld [vmem:[%s1712_s12 + $0x140] sm:$0xff] }
 0x13b   : >> { %1142 = vst [vmem:[%s1708_s11 + $0x130] sm:$0xff] %v1141_v9  ;;  %v1147_v12 = vld [vmem:[%s1712_s12 + $0x148] sm:$0xff]  ;;  %1144 = vst [vmem:[%s1708_s11 + $0x138] sm:$0xff] %v1143_v10  ;;  %v1149_v13 = vld [vmem:[%s1712_s12 + $0x150] sm:$0xff] }
 0x13c   : >> { %1146 = vst [vmem:[%s1708_s11 + $0x140] sm:$0xff] %v1145_v11  ;;  %1148 = vst [vmem:[%s1708_s11 + $0x148] sm:$0xff] %v1147_v12  ;;  %v1151_v14 = vld [vmem:[%s1712_s12 + $0x158] sm:$0xff]  ;;  %v1153_v15 = vld [vmem:[%s1712_s12 + $0x160] sm:$0xff] }
 0x13d   : >> { %1150 = vst [vmem:[%s1708_s11 + $0x150] sm:$0xff] %v1149_v13  ;;  %1152 = vst [vmem:[%s1708_s11 + $0x158] sm:$0xff] %v1151_v14  ;;  %v1155_v16 = vld [vmem:[%s1712_s12 + $0x168] sm:$0xff]  ;;  %v1157_v17 = vld [vmem:[%s1712_s12 + $0x170] sm:$0xff] }
 0x13e   : >> { %1154 = vst [vmem:[%s1708_s11 + $0x160] sm:$0xff] %v1153_v15  ;;  %v1159_v18 = vld [vmem:[%s1712_s12 + $0x178] sm:$0xff]  ;;  %1156 = vst [vmem:[%s1708_s11 + $0x168] sm:$0xff] %v1155_v16  ;;  %v1161_v19 = vld [vmem:[%s1712_s12 + $0x180] sm:$0xff] }
 0x13f   : >> { %1158 = vst [vmem:[%s1708_s11 + $0x170] sm:$0xff] %v1157_v17  ;;  %1160 = vst [vmem:[%s1708_s11 + $0x178] sm:$0xff] %v1159_v18  ;;  %v1163_v20 = vld [vmem:[%s1712_s12 + $0x188] sm:$0xff]  ;;  %v1165_v21 = vld [vmem:[%s1712_s12 + $0x190] sm:$0xff] }
 0x140   : >> { %1162 = vst [vmem:[%s1708_s11 + $0x180] sm:$0xff] %v1161_v19  ;;  %1164 = vst [vmem:[%s1708_s11 + $0x188] sm:$0xff] %v1163_v20  ;;  %v1167_v22 = vld [vmem:[%s1712_s12 + $0x198] sm:$0xff]  ;;  %v1169_v23 = vld [vmem:[%s1712_s12 + $0x1a0] sm:$0xff] }
 0x141   : >> { %1166 = vst [vmem:[%s1708_s11 + $0x190] sm:$0xff] %v1165_v21  ;;  %v1171_v24 = vld [vmem:[%s1712_s12 + $0x1a8] sm:$0xff]  ;;  %1168 = vst [vmem:[%s1708_s11 + $0x198] sm:$0xff] %v1167_v22  ;;  %v1173_v25 = vld [vmem:[%s1712_s12 + $0x1b0] sm:$0xff] }
 0x142   : >> { %1170 = vst [vmem:[%s1708_s11 + $0x1a0] sm:$0xff] %v1169_v23  ;;  %1172 = vst [vmem:[%s1708_s11 + $0x1a8] sm:$0xff] %v1171_v24  ;;  %v1175_v26 = vld [vmem:[%s1712_s12 + $0x1b8] sm:$0xff]  ;;  %v1177_v27 = vld [vmem:[%s1712_s12 + $0x1c0] sm:$0xff] }
 0x143   : >> { %1174 = vst [vmem:[%s1708_s11 + $0x1b0] sm:$0xff] %v1173_v25  ;;  %1176 = vst [vmem:[%s1708_s11 + $0x1b8] sm:$0xff] %v1175_v26  ;;  %v1179_v28 = vld [vmem:[%s1712_s12 + $0x1c8] sm:$0xff]  ;;  %v1181_v29 = vld [vmem:[%s1712_s12 + $0x1d0] sm:$0xff]  ;;  %1061 = sbr.rel (!%p1058_p12) target bundleno = 295 (0x127), region = 118 }
 0x144   : >> { %1178 = vst [vmem:[%s1708_s11 + $0x1c0] sm:$0xff] %v1177_v27  ;;  %v1183_v30 = vld [vmem:[%s1712_s12 + $0x1d8] sm:$0xff]  ;;  %1180 = vst [vmem:[%s1708_s11 + $0x1c8] sm:$0xff] %v1179_v28  ;;  %v1185_v31 = vld [vmem:[%s1712_s12 + $0x1e0] sm:$0xff] }
 0x145   : >> { %1182 = vst [vmem:[%s1708_s11 + $0x1d0] sm:$0xff] %v1181_v29  ;;  %1184 = vst [vmem:[%s1708_s11 + $0x1d8] sm:$0xff] %v1183_v30  ;;  %v1187_v32 = vld [vmem:[%s1712_s12 + $0x1e8] sm:$0xff]  ;;  %v1189_v33 = vld [vmem:[%s1712_s12 + $0x1f0] sm:$0xff] }
 0x146   : >> { %1186 = vst [vmem:[%s1708_s11 + $0x1e0] sm:$0xff] %v1185_v31  ;;  %1188 = vst [vmem:[%s1708_s11 + $0x1e8] sm:$0xff] %v1187_v32  ;;  %v1191_v34 = vld [vmem:[%s1712_s12 + $0x1f8] sm:$0xff]  ;;  %s2142_s12 = smov %s2009_s19 }
 0x147   : >> { %1190 = vst [vmem:[%s1708_s11 + $0x1f0] sm:$0xff] %v1189_v33  ;;  %1192 = vst [vmem:[%s1708_s11 + $0x1f8] sm:$0xff] %v1191_v34  ;;  %s2141_s11 = smov %s2012_s20 }
 0x148 PF: > { %s2117_s21 = sand.u32 63, %s2148_s3   ;;  %s1418_s22 = sshll.u32 %s1942_s9, 9 }
 0x149   : > { %s1204_s23 = scalar_lea.vmem %s1863_s30, %s1418_s22 [#allocation2]   ;;  %s1206_s24 = scalar_lea.vmem %s1936_s7, %s1418_s22  }
 0x14a   : > { %p1412_p13 = scmp.le.s32.totalorder %s2117_s21, 0 }
 0x14b   : > { %s1722_s25 = smov (!%p1412_p13), %s1206_s24   ;;  %s1726_s26 = smov (!%p1412_p13), %s1204_s23  }
 0x14c   : > { %1297 = sbr.rel (%p1412_p13) target bundleno = 345 (0x159), region = 123  ;;  %s1730_s27 = smov (!%p1412_p13), 0  }
 0x14d   : > { %s1734_s28 = smov (!%p1412_p13), 0  }
 0x151 LB: >> { %v1216_v35 = vld [vmem:[%s1728_s26] sm:$0xff]  ;;  %s1218_s29 = sadd.s32 1, %s1732_s27  ;;  %s1210_s28 = sadd.s32 1, %s1736_s28   ;;  %s1736_s28 = sphi %s1734_s28, %s1210_s28   ;;  %s1732_s27 = sphi %s1730_s27, %s1731_s27   ;;  %s1728_s26 = sphi %s1726_s26, %s1223_s26   ;;  %s1724_s25 = sphi %s1722_s25, %s1224_s25  }
 0x152   : >> { %1217 = vst [vmem:[%s1724_s25] sm:$0xff] %v1216_v35  ;;  %p1219_p0 = scmp.ge.s32.totalorder %s1218_s29, %s2117_s21  ;;  %p1209_p1 = scmp.ge.s32.totalorder %s1210_s28, %s2117_s21 }
 0x154   : >> { %s2152_s29 = smov (%p1219_p0, %s1218_s29), 0  ;;  %1212 = sbr.rel (!%p1209_p1) target bundleno = 337 (0x151), region = 129 }
 0x155   : >> { %s1413_s30 = sshll.u32 %s2152_s29, 3  ;;  %s1731_s27 = smov %s2152_s29  }
 0x156   : >> { %s1223_s26 = scalar_lea.vmem %s1204_s23, %s1413_s30 [#allocation2]   ;;  %s1224_s25 = scalar_lea.vmem %s1206_s24, %s1413_s30  }
 0x159 PF: > { %p9_p2 = scmp.ge.s32.totalorder %s1768_s13, 7   ;;  %s2144_s9 = smov %s1700_s10 }
 0x15a   : > { %s2145_s10 = smov %s1776_s16  ;;  %s2146_s11 = smov %s1768_s13 }
 0x15b   :  { %11 = sbr.rel (!%p9_p2) target bundleno = 2 (0x2), region = 140 }

</bundles_post_ra>
